<compile_context>
chip_gen: v5e
topology: v5e:2x2
jax: 0.10.0
libtpu: 0.0.40
codegen_flags: <defaults>
</compile_context>

<pallas_src>
import functools

import numpy as np
import jax
import jax.numpy as jnp
from jax.experimental import pallas as pl
from jax.experimental.pallas import tpu as pltpu


# -----------------------------------------------------------------------------
# Pixel ordering: quadtree permutation so stride-2 subsample == prefix slice
# -----------------------------------------------------------------------------
def _quad_perm(H, W, depth):
    """Per-image pixel order whose first H*W/4 entries are the (even, even)
    positions — recursively — so `depth` successive stride-2 subsamples are all
    contiguous prefix slices of the lane axis."""
    if depth == 0:
        return [(y, x) for y in range(H) for x in range(W)]
    inner = _quad_perm(H // 2, W // 2, depth - 1)
    group_a = [(2 * y, 2 * x) for (y, x) in inner]
    in_a = set(group_a)
    rest = [(y, x) for y in range(H) for x in range(W) if (y, x) not in in_a]
    return group_a + rest


def _pick_kimg(N, lanes_in, lanes_out):
    """Images per grid step: smallest divisor of N keeping both the input and the
    output tile lane-width a multiple of 128; else all N images (full-dim blocks
    are always legal).  Large whole-image tiles suit single-TC v5e/v6e; when the
    grid has >1 step the 'parallel' axis lets a v7x megacore split it."""
    for k in range(1, N):
        if N % k == 0 and (k * lanes_in) % 128 == 0 and (k * lanes_out) % 128 == 0:
            return k
    return N


def _nbytes(shape, dtype):
    return int(np.prod(shape)) * np.dtype(dtype).itemsize


def _mosaic_params(grid, block_bytes):
    # Explicit VMEM budget: double-buffered blocks + slack, capped below v7x's
    # 64 MiB physical VMEM so the same tiling is safe on v5e / v6e / v7x.
    lim = int(min(max(4 * block_bytes, 32 << 20), 48 << 20))
    return pltpu.CompilerParams(
        dimension_semantics=("parallel",) * len(grid),
        vmem_limit_bytes=lim)


def _const_spec(arr):
    """Full-array VMEM block with a constant index map (fetched once, reused)."""
    zeros = (0,) * arr.ndim
    return pl.BlockSpec(arr.shape, lambda t: zeros)


# -----------------------------------------------------------------------------
# In-kernel building blocks
# -----------------------------------------------------------------------------
def _dag_nodes(mixw_ref, s, wts_ref, sc_ref, bi_ref, *, nb, window):
    """Sliding-window mixed bigDAG; all states stay in vregs/VMEM."""
    states = [s, s]                         # forward always has s0 == s1
    for k in range(nb):                     # static unroll, no HBM traffic
        m = min(window, len(states))
        # TODO(synk): SearchBigDAG internals are not in the provided source; the
        # truncated alpha row (first m of `window` softmaxed weights) is used
        # without per-window renormalization, matching the previous surrogate.
        a = [mixw_ref[k, j] for j in range(m)]           # hoisted SMEM scalars
        mix = a[0] * states[-m]
        for j in range(1, m):
            mix = mix + a[j] * states[-m + j]
        mix = jnp.maximum(mix, 0.0)                       # ReLU
        y = jnp.dot(wts_ref[k], mix.astype(jnp.bfloat16),
                    preferred_element_type=jnp.float32)   # 1x1 conv (bf16 MXU)
        states.append(y * sc_ref[k] + bi_ref[k])          # folded eval-BN
        states = states[-max(window, 2):]                 # bound live states
    return states[-2], states[-1]


def _reduce_epilogue(s0, s1, wr_ref, rsc_ref, rbi_ref, o_ref, *, kimg, hw_in):
    """Fused reduction cell: per-image prefix slice (== stride-2 subsample in the
    quadtree layout) -> channel concat -> ReLU -> 1x1 conv -> folded BN."""
    hw_out = hw_in // 4
    pieces = []
    for j in range(kimg):
        lo = j * hw_in
        a = s0[:, lo:lo + hw_out]
        b = s1[:, lo:lo + hw_out]
        pieces.append(jnp.concatenate([a, b], axis=0))    # concat(s_{-2}, s_{-1})
    cat = jnp.concatenate(pieces, axis=1) if kimg > 1 else pieces[0]
    cat = jnp.maximum(cat, 0.0)
    y = jnp.dot(wr_ref[...], cat.astype(jnp.bfloat16),
                preferred_element_type=jnp.float32)
    o_ref[...] = y * rsc_ref[...] + rbi_ref[...]


# -----------------------------------------------------------------------------
# Kernel 1: stem (1-matmul conv3x3+BN) -> bigDAG1 -> reduce cell 1
# -----------------------------------------------------------------------------
def _stem_dag_reduce_kernel(mixw_ref, p_ref, ws_ref, ssc_ref, sbi_ref,
                            wts_ref, sc_ref, bi_ref, wr_ref, rsc_ref, rbi_ref,
                            o_ref, *, nb, window, kimg, hw_in):
    # Stem: one MXU push over K = 9*Cin on the lane-dense im2col block.
    s = jnp.dot(ws_ref[...], p_ref[...], preferred_element_type=jnp.float32)
    s = s * ssc_ref[...] + sbi_ref[...]
    s0, s1 = _dag_nodes(mixw_ref, s, wts_ref, sc_ref, bi_ref,
                        nb=nb, window=window)
    _reduce_epilogue(s0, s1, wr_ref, rsc_ref, rbi_ref, o_ref,
                     kimg=kimg, hw_in=hw_in)


# -----------------------------------------------------------------------------
# Kernel 2: bigDAG2 -> reduce cell 2
# -----------------------------------------------------------------------------
def _dag_reduce_kernel(mixw_ref, x_ref, wts_ref, sc_ref, bi_ref,
                       wr_ref, rsc_ref, rbi_ref, o_ref,
                       *, nb, window, kimg, hw_in):
    s0, s1 = _dag_nodes(mixw_ref, x_ref[...], wts_ref, sc_ref, bi_ref,
                        nb=nb, window=window)
    _reduce_epilogue(s0, s1, wr_ref, rsc_ref, rbi_ref, o_ref,
                     kimg=kimg, hw_in=hw_in)


# -----------------------------------------------------------------------------
# Kernel 3: bigDAG3 -> GAP -> Linear head (stores logits^T, lane-dense)
# -----------------------------------------------------------------------------
def _dag_head_kernel(mixw_ref, x_ref, wts_ref, sc_ref, bi_ref,
                     wl_ref, bl_ref, o_ref, *, nb, window, kimg, hw_in):
    s0, s1 = _dag_nodes(mixw_ref, x_ref[...], wts_ref, sc_ref, bi_ref,
                        nb=nb, window=window)
    inv = 1.0 / float(hw_in)
    cols = []
    for j in range(kimg):                   # per-image GAP stays in vregs
        lo = j * hw_in
        pa = jnp.sum(s0[:, lo:lo + hw_in], axis=1, keepdims=True) * inv
        pb = jnp.sum(s1[:, lo:lo + hw_in], axis=1, keepdims=True) * inv
        cols.append(jnp.concatenate([pa, pb], axis=0))    # [2*Cn, 1]
    pooled = jnp.concatenate(cols, axis=1) if kimg > 1 else cols[0]
    o_ref[...] = (jnp.dot(wl_ref[...], pooled,
                          preferred_element_type=jnp.float32) + bl_ref[...])


# -----------------------------------------------------------------------------
# Wrappers (one pallas_call per stage)
# -----------------------------------------------------------------------------
def stage1_forward(w_rows, patT, stem_p, dag_p, red_p, *, N, hw, window):
    ws, ssc, sbi = stem_p
    wts, sc, bi = dag_p
    wr, rsc, rbi = red_p
    nb = wts.shape[0]
    cout = wr.shape[0]
    kimg = _pick_kimg(N, hw, hw // 4)
    grid = (N // kimg,)
    kern = functools.partial(_stem_dag_reduce_kernel, nb=nb, window=window,
                             kimg=kimg, hw_in=hw)
    ops = (ws, ssc, sbi, wts, sc, bi, wr, rsc, rbi)
    in_specs = ([pl.BlockSpec(memory_space=pltpu.MemorySpace.SMEM),
                 pl.BlockSpec((patT.shape[0], kimg * hw), lambda t: (0, t))]
                + [_const_spec(a) for a in ops])
    out_spec = pl.BlockSpec((cout, kimg * hw // 4), lambda t: (0, t))
    blk = (_nbytes((patT.shape[0], kimg * hw), patT.dtype)
           + sum(_nbytes(a.shape, a.dtype) for a in ops)
           + _nbytes((cout, kimg * hw // 4), jnp.float32))
    return pl.pallas_call(
        kern,
        out_shape=jax.ShapeDtypeStruct((cout, N * hw // 4), jnp.float32),
        grid=grid, in_specs=in_specs, out_specs=out_spec,
        compiler_params=_mosaic_params(grid, blk),
    )(w_rows, patT, *ops)


def stage_mid_forward(w_rows, x, dag_p, red_p, *, N, hw, window):
    wts, sc, bi = dag_p
    wr, rsc, rbi = red_p
    nb = wts.shape[0]
    cout = wr.shape[0]
    kimg = _pick_kimg(N, hw, hw // 4)
    grid = (N // kimg,)
    kern = functools.partial(_dag_reduce_kernel, nb=nb, window=window,
                             kimg=kimg, hw_in=hw)
    ops = (wts, sc, bi, wr, rsc, rbi)
    in_specs = ([pl.BlockSpec(memory_space=pltpu.MemorySpace.SMEM),
                 pl.BlockSpec((x.shape[0], kimg * hw), lambda t: (0, t))]
                + [_const_spec(a) for a in ops])
    out_spec = pl.BlockSpec((cout, kimg * hw // 4), lambda t: (0, t))
    blk = (_nbytes((x.shape[0], kimg * hw), x.dtype)
           + sum(_nbytes(a.shape, a.dtype) for a in ops)
           + _nbytes((cout, kimg * hw // 4), jnp.float32))
    return pl.pallas_call(
        kern,
        out_shape=jax.ShapeDtypeStruct((cout, N * hw // 4), jnp.float32),
        grid=grid, in_specs=in_specs, out_specs=out_spec,
        compiler_params=_mosaic_params(grid, blk),
    )(w_rows, x, *ops)


def stage_head_forward(w_rows, x, dag_p, w_lin, b_lin, *, N, hw, window):
    wts, sc, bi = dag_p
    nb = wts.shape[0]
    ncls = w_lin.shape[0]
    kimg = _pick_kimg(N, hw, 1)
    grid = (N // kimg,)
    kern = functools.partial(_dag_head_kernel, nb=nb, window=window,
                             kimg=kimg, hw_in=hw)
    ops = (wts, sc, bi, w_lin, b_lin)
    in_specs = ([pl.BlockSpec(memory_space=pltpu.MemorySpace.SMEM),
                 pl.BlockSpec((x.shape[0], kimg * hw), lambda t: (0, t))]
                + [_const_spec(a) for a in ops])
    out_spec = pl.BlockSpec((ncls, kimg), lambda t: (0, t))
    blk = (_nbytes((x.shape[0], kimg * hw), x.dtype)
           + sum(_nbytes(a.shape, a.dtype) for a in ops)
           + _nbytes((ncls, kimg), jnp.float32))
    logits_t = pl.pallas_call(
        kern,
        out_shape=jax.ShapeDtypeStruct((ncls, N), jnp.float32),
        grid=grid, in_specs=in_specs, out_specs=out_spec,
        compiler_params=_mosaic_params(grid, blk),
    )(w_rows, x, *ops)
    return logits_t.T                        # tiny [n_classes, N] glue transpose


# -----------------------------------------------------------------------------
# Stem im2col (wrapper / XLA glue): lane-dense, quad-permuted [9*Cin, N*H*W]
# -----------------------------------------------------------------------------
def stem_im2col(x_nchw, ys, xs):
    """Build the 3x3-conv im2col once, columns ordered (image-major, quadtree per
    image).  Read amplification is 9x the small-channel network input and
    replaces 9 in-kernel relayout passes + a K=Cin per-tap MXU loop."""
    N, Cin, H, W = x_nchw.shape
    xp = jnp.pad(x_nchw, ((0, 0), (0, 0), (1, 1), (1, 1)))
    taps = []
    for dy in range(3):
        for dx in range(3):
            taps.append(xp[:, :, ys + dy, xs + dx])        # [N, Cin, H*W]
    pat = jnp.stack(taps, axis=0)                          # [9, N, Cin, H*W]
    pat = pat.transpose(0, 2, 1, 3).reshape(9 * Cin, N * H * W)
    return pat.astype(jnp.bfloat16)                        # bf16 MXU operand


# -----------------------------------------------------------------------------
# Forward: mirrors SearchStage.forward
# -----------------------------------------------------------------------------
def search_stage_forward(x_nchw, weights_dag, params, perm_yx):
    """stem -> bigDAG1 -> reduce -> bigDAG2 -> reduce -> bigDAG3 -> GAP -> Linear."""
    nb, window = params["n_big_nodes"], params["window"]
    N, _, H, W = x_nchw.shape
    ys, xs = perm_yx
    hw1 = H * W
    patT = stem_im2col(x_nchw.astype(jnp.float32), ys, xs)

    s = stage1_forward(weights_dag[0 * nb:1 * nb], patT,
                       params["stem"], params["dag1"], params["reduce1"],
                       N=N, hw=hw1, window=window)
    hw2 = hw1 // 4
    s = stage_mid_forward(weights_dag[1 * nb:2 * nb], s,
                          params["dag2"], params["reduce2"],
                          N=N, hw=hw2, window=window)
    hw3 = hw2 // 4
    return stage_head_forward(weights_dag[2 * nb:3 * nb], s,
                              params["dag3"], params["linear_w"],
                              params["linear_b"],
                              N=N, hw=hw3, window=window)


# -----------------------------------------------------------------------------
# Deterministic synthetic parameters (shapes follow SearchStage.__init__)
# -----------------------------------------------------------------------------
def conv_bn_params(key, cin, cout, eps=1e-5):
    kw, kg, kb, km = jax.random.split(key, 4)
    w = jax.random.normal(kw, (cout, cin), jnp.float32) / jnp.sqrt(float(cin))
    gamma = 1.0 + 0.1 * jax.random.normal(kg, (cout,), jnp.float32)
    beta = 0.1 * jax.random.normal(kb, (cout,), jnp.float32)
    mean = 0.1 * jax.random.normal(km, (cout,), jnp.float32)
    var = jnp.ones((cout,), jnp.float32)
    inv = gamma / jnp.sqrt(var + eps)
    # matmul weights pre-cast to bf16 (halves weight DMA/VMEM; f32 accumulation)
    return (w.astype(jnp.bfloat16),
            inv.reshape(cout, 1),
            (beta - mean * inv).reshape(cout, 1))


def stem_conv_bn_params(key, cin, cout, eps=1e-5):
    kw, kg, kb, km = jax.random.split(key, 4)
    w = jax.random.normal(kw, (cout, 9, cin), jnp.float32) / jnp.sqrt(float(9 * cin))
    gamma = 1.0 + 0.1 * jax.random.normal(kg, (cout,), jnp.float32)
    beta = 0.1 * jax.random.normal(kb, (cout,), jnp.float32)
    mean = 0.1 * jax.random.normal(km, (cout,), jnp.float32)
    var = jnp.ones((cout,), jnp.float32)
    inv = gamma / jnp.sqrt(var + eps)
    return (w.reshape(cout, 9 * cin).astype(jnp.bfloat16),  # rows: (tap, cin)
            inv.reshape(cout, 1),
            (beta - mean * inv).reshape(cout, 1))


def dag_node_params(key, cn, nb):
    ws, ss, bs = [], [], []
    for k in jax.random.split(key, nb):
        w, sc, bi = conv_bn_params(k, cn, cn)
        ws.append(w)
        ss.append(sc)
        bs.append(bi)
    return jnp.stack(ws), jnp.stack(ss), jnp.stack(bs)


if __name__ == "__main__":
    # Non-ImageNet branch of SearchStage.__init__:
    # C_in=4, C=2, stem_multiplier=cell_multiplier=4, n_big_nodes=2, slide_window=3,
    # n_classes=10, 16x16 input  ->  Linear(32*C = 64, 10).
    C_in, C, n_classes = 4, 2, 10
    n_big_nodes, window = 2, 3
    N, H, W = 2, 16, 16
    Cn1, Cn2, Cn3 = 4 * C, 8 * C, 16 * C          # per-stage node channels

    key = jax.random.PRNGKey(0)
    keys = jax.random.split(key, 16)

    params = {
        "n_big_nodes": n_big_nodes,
        "window": window,
        "stem": stem_conv_bn_params(keys[0], C_in, 4 * C),
        "dag1": dag_node_params(keys[1], Cn1, n_big_nodes),
        "reduce1": conv_bn_params(keys[4], 2 * Cn1, Cn2),
        "dag2": dag_node_params(keys[5], Cn2, n_big_nodes),
        "reduce2": conv_bn_params(keys[8], 2 * Cn2, Cn3),
        "dag3": dag_node_params(keys[9], Cn3, n_big_nodes),
        "linear_w": jax.random.normal(keys[12], (n_classes, 2 * Cn3), jnp.float32)
                    / jnp.sqrt(float(2 * Cn3)),
        "linear_b": 0.01 * jax.random.normal(keys[13], (n_classes, 1), jnp.float32),
    }

    perm = _quad_perm(H, W, 2)                     # two reduction stages
    ys = np.array([p[0] for p in perm], dtype=np.int32)
    xs = np.array([p[1] for p in perm], dtype=np.int32)

    x = jax.random.normal(keys[14], (N, C_in, H, W), jnp.float32)      # NCHW input
    alphas = jax.random.normal(keys[15], (3 * n_big_nodes, window), jnp.float32)
    weights_dag = jax.nn.softmax(alphas, axis=-1)                      # weights_DAG

    fwd = jax.jit(lambda xx, wd: search_stage_forward(xx, wd, params, (ys, xs)))
    logits = fwd(x, weights_dag)
    jax.block_until_ready(logits)
    assert logits.shape == (N, n_classes)
    assert bool(jnp.all(jnp.isfinite(logits)))
    print("KERNEL_OK")
</pallas_src>

<mosaic_0001>
module attributes {stable_mosaic.version = 11 : i64} {
  func.func @_dag_reduce_kernel(%arg0: i32, %arg1: memref<2x3xf32, #tpu.memory_space<smem>>, %arg2: memref<16x128xf32, #tpu.memory_space<vmem>>, %arg3: memref<2x16x16xbf16, #tpu.memory_space<vmem>>, %arg4: memref<2x16x1xf32, #tpu.memory_space<vmem>>, %arg5: memref<2x16x1xf32, #tpu.memory_space<vmem>>, %arg6: memref<32x32xbf16, #tpu.memory_space<vmem>>, %arg7: memref<32x1xf32, #tpu.memory_space<vmem>>, %arg8: memref<32x1xf32, #tpu.memory_space<vmem>>, %arg9: memref<32x32xf32, #tpu.memory_space<vmem>>) attributes {dimension_semantics = [#tpu.dimension_semantics<parallel>], iteration_bounds = array<i64: 1>, scalar_prefetch = 0 : i64, scratch_operands = 0 : i64, tpu.core_type = #tpu.core_type<tc>, window_params = [{transform_indices = @transform_0, window_bounds = array<i64: 2, 3>}, {transform_indices = @transform_1, window_bounds = array<i64: 16, 128>}, {pipeline_mode = #tpu.pipeline_mode<synchronous>, transform_indices = @transform_2, window_bounds = array<i64: 2, 16, 16>}, {pipeline_mode = #tpu.pipeline_mode<synchronous>, transform_indices = @transform_3, window_bounds = array<i64: 2, 16, 1>}, {pipeline_mode = #tpu.pipeline_mode<synchronous>, transform_indices = @transform_4, window_bounds = array<i64: 2, 16, 1>}, {pipeline_mode = #tpu.pipeline_mode<synchronous>, transform_indices = @transform_5, window_bounds = array<i64: 32, 32>}, {pipeline_mode = #tpu.pipeline_mode<synchronous>, transform_indices = @transform_6, window_bounds = array<i64: 32, 1>}, {pipeline_mode = #tpu.pipeline_mode<synchronous>, transform_indices = @transform_7, window_bounds = array<i64: 32, 1>}, {transform_indices = @transform_8, window_bounds = array<i64: 32, 32>}]} {
    %c0 = arith.constant 0 : index
    %c0_0 = arith.constant 0 : index
    %0 = vector.load %arg2[%c0, %c0_0] : memref<16x128xf32, #tpu.memory_space<vmem>>, vector<16x128xf32>
    %c0_1 = arith.constant 0 : index
    %c0_2 = arith.constant 0 : index
    %1 = memref.load %arg1[%c0_1, %c0_2] : memref<2x3xf32, #tpu.memory_space<smem>>
    %c0_3 = arith.constant 0 : index
    %c1 = arith.constant 1 : index
    %2 = memref.load %arg1[%c0_3, %c1] : memref<2x3xf32, #tpu.memory_space<smem>>
    %3 = vector.broadcast %1 : f32 to vector<16x128xf32>
    %4 = arith.mulf %3, %0 : vector<16x128xf32>
    %5 = vector.broadcast %2 : f32 to vector<16x128xf32>
    %6 = arith.mulf %5, %0 : vector<16x128xf32>
    %7 = arith.addf %4, %6 : vector<16x128xf32>
    %cst = arith.constant 0.000000e+00 : f32
    %8 = vector.broadcast %cst : f32 to vector<16x128xf32>
    %9 = arith.maximumf %7, %8 : vector<16x128xf32>
    %c0_4 = arith.constant 0 : index
    %c0_5 = arith.constant 0 : index
    %c0_6 = arith.constant 0 : index
    %10 = vector.load %arg3[%c0_4, %c0_5, %c0_6] : memref<2x16x16xbf16, #tpu.memory_space<vmem>>, vector<1x16x16xbf16>
    %11 = vector.shape_cast %10 : vector<1x16x16xbf16> to vector<16x16xbf16>
    %12 = arith.truncf %9 : vector<16x128xf32> to vector<16x128xbf16>
    %cst_7 = arith.constant dense<0.000000e+00> : vector<16x128xf32>
    %13 = tpu.matmul %11, %12, %cst_7 {dimension_numbers = #tpu.dot_dimension_numbers<[1], [0], [0], [1], [0, 0, 1, 1], [], []>} : vector<16x16xbf16>, vector<16x128xbf16>, vector<16x128xf32> -> vector<16x128xf32>
    %c0_8 = arith.constant 0 : index
    %c0_9 = arith.constant 0 : index
    %c0_10 = arith.constant 0 : index
    %14 = vector.load %arg4[%c0_8, %c0_9, %c0_10] : memref<2x16x1xf32, #tpu.memory_space<vmem>>, vector<1x16x1xf32>
    %15 = vector.shape_cast %14 : vector<1x16x1xf32> to vector<16x1xf32>
    %16 = vector.broadcast %15 : vector<16x1xf32> to vector<16x128xf32>
    %17 = arith.mulf %13, %16 : vector<16x128xf32>
    %c0_11 = arith.constant 0 : index
    %c0_12 = arith.constant 0 : index
    %c0_13 = arith.constant 0 : index
    %18 = vector.load %arg5[%c0_11, %c0_12, %c0_13] : memref<2x16x1xf32, #tpu.memory_space<vmem>>, vector<1x16x1xf32>
    %19 = vector.shape_cast %18 : vector<1x16x1xf32> to vector<16x1xf32>
    %20 = vector.broadcast %19 : vector<16x1xf32> to vector<16x128xf32>
    %21 = arith.addf %17, %20 : vector<16x128xf32>
    %c1_14 = arith.constant 1 : index
    %c0_15 = arith.constant 0 : index
    %22 = memref.load %arg1[%c1_14, %c0_15] : memref<2x3xf32, #tpu.memory_space<smem>>
    %c1_16 = arith.constant 1 : index
    %c1_17 = arith.constant 1 : index
    %23 = memref.load %arg1[%c1_16, %c1_17] : memref<2x3xf32, #tpu.memory_space<smem>>
    %c1_18 = arith.constant 1 : index
    %c2 = arith.constant 2 : index
    %24 = memref.load %arg1[%c1_18, %c2] : memref<2x3xf32, #tpu.memory_space<smem>>
    %25 = vector.broadcast %22 : f32 to vector<16x128xf32>
    %26 = arith.mulf %25, %0 : vector<16x128xf32>
    %27 = vector.broadcast %23 : f32 to vector<16x128xf32>
    %28 = arith.mulf %27, %0 : vector<16x128xf32>
    %29 = arith.addf %26, %28 : vector<16x128xf32>
    %30 = vector.broadcast %24 : f32 to vector<16x128xf32>
    %31 = arith.mulf %30, %21 : vector<16x128xf32>
    %32 = arith.addf %29, %31 : vector<16x128xf32>
    %cst_19 = arith.constant 0.000000e+00 : f32
    %33 = vector.broadcast %cst_19 : f32 to vector<16x128xf32>
    %34 = arith.maximumf %32, %33 : vector<16x128xf32>
    %c1_20 = arith.constant 1 : index
    %c0_21 = arith.constant 0 : index
    %c0_22 = arith.constant 0 : index
    %35 = vector.load %arg3[%c1_20, %c0_21, %c0_22] : memref<2x16x16xbf16, #tpu.memory_space<vmem>>, vector<1x16x16xbf16>
    %36 = vector.shape_cast %35 : vector<1x16x16xbf16> to vector<16x16xbf16>
    %37 = arith.truncf %34 : vector<16x128xf32> to vector<16x128xbf16>
    %cst_23 = arith.constant dense<0.000000e+00> : vector<16x128xf32>
    %38 = tpu.matmul %36, %37, %cst_23 {dimension_numbers = #tpu.dot_dimension_numbers<[1], [0], [0], [1], [0, 0, 1, 1], [], []>} : vector<16x16xbf16>, vector<16x128xbf16>, vector<16x128xf32> -> vector<16x128xf32>
    %c1_24 = arith.constant 1 : index
    %c0_25 = arith.constant 0 : index
    %c0_26 = arith.constant 0 : index
    %39 = vector.load %arg4[%c1_24, %c0_25, %c0_26] : memref<2x16x1xf32, #tpu.memory_space<vmem>>, vector<1x16x1xf32>
    %40 = vector.shape_cast %39 : vector<1x16x1xf32> to vector<16x1xf32>
    %41 = vector.broadcast %40 : vector<16x1xf32> to vector<16x128xf32>
    %42 = arith.mulf %38, %41 : vector<16x128xf32>
    %c1_27 = arith.constant 1 : index
    %c0_28 = arith.constant 0 : index
    %c0_29 = arith.constant 0 : index
    %43 = vector.load %arg5[%c1_27, %c0_28, %c0_29] : memref<2x16x1xf32, #tpu.memory_space<vmem>>, vector<1x16x1xf32>
    %44 = vector.shape_cast %43 : vector<1x16x1xf32> to vector<16x1xf32>
    %45 = vector.broadcast %44 : vector<16x1xf32> to vector<16x128xf32>
    %46 = arith.addf %42, %45 : vector<16x128xf32>
    %47 = vector.extract_strided_slice %21 {offsets = [0, 0], sizes = [16, 16], strides = [1, 1]} : vector<16x128xf32> to vector<16x16xf32>
    %48 = vector.extract_strided_slice %46 {offsets = [0, 0], sizes = [16, 16], strides = [1, 1]} : vector<16x128xf32> to vector<16x16xf32>
    %49 = tpu.concatenate %47, %48 in 0 : vector<16x16xf32>, vector<16x16xf32> -> vector<32x16xf32>
    %50 = vector.extract_strided_slice %21 {offsets = [0, 64], sizes = [16, 16], strides = [1, 1]} : vector<16x128xf32> to vector<16x16xf32>
    %51 = vector.extract_strided_slice %46 {offsets = [0, 64], sizes = [16, 16], strides = [1, 1]} : vector<16x128xf32> to vector<16x16xf32>
    %52 = tpu.concatenate %50, %51 in 0 : vector<16x16xf32>, vector<16x16xf32> -> vector<32x16xf32>
    %53 = tpu.concatenate %49, %52 in 1 : vector<32x16xf32>, vector<32x16xf32> -> vector<32x32xf32>
    %cst_30 = arith.constant 0.000000e+00 : f32
    %54 = vector.broadcast %cst_30 : f32 to vector<32x32xf32>
    %55 = arith.maximumf %53, %54 : vector<32x32xf32>
    %c0_31 = arith.constant 0 : index
    %c0_32 = arith.constant 0 : index
    %56 = vector.load %arg6[%c0_31, %c0_32] : memref<32x32xbf16, #tpu.memory_space<vmem>>, vector<32x32xbf16>
    %57 = arith.truncf %55 : vector<32x32xf32> to vector<32x32xbf16>
    %cst_33 = arith.constant dense<0.000000e+00> : vector<32x32xf32>
    %58 = tpu.matmul %56, %57, %cst_33 {dimension_numbers = #tpu.dot_dimension_numbers<[1], [0], [0], [1], [0, 0, 1, 1], [], []>} : vector<32x32xbf16>, vector<32x32xbf16>, vector<32x32xf32> -> vector<32x32xf32>
    %c0_34 = arith.constant 0 : index
    %c0_35 = arith.constant 0 : index
    %59 = vector.load %arg7[%c0_34, %c0_35] : memref<32x1xf32, #tpu.memory_space<vmem>>, vector<32x1xf32>
    %60 = vector.broadcast %59 : vector<32x1xf32> to vector<32x32xf32>
    %61 = arith.mulf %58, %60 : vector<32x32xf32>
    %c0_36 = arith.constant 0 : index
    %c0_37 = arith.constant 0 : index
    %62 = vector.load %arg8[%c0_36, %c0_37] : memref<32x1xf32, #tpu.memory_space<vmem>>, vector<32x1xf32>
    %63 = vector.broadcast %62 : vector<32x1xf32> to vector<32x32xf32>
    %64 = arith.addf %61, %63 : vector<32x32xf32>
    %c0_38 = arith.constant 0 : index
    %c0_39 = arith.constant 0 : index
    %65 = vector.load %arg9[%c0_38, %c0_39] : memref<32x32xf32, #tpu.memory_space<vmem>>, vector<32x32xf32>
    tpu.vector_store %arg9[%c0_38, %c0_39], %64 {strides = array<i32>} : memref<32x32xf32, #tpu.memory_space<vmem>>, vector<32x32xf32>,
    return
  }
  func.func @transform_0(%arg0: i32) -> (i32, i32) {
    %c0_i32 = arith.constant 0 : i32
    %c0_i32_0 = arith.constant 0 : i32
    %c0_i32_1 = arith.constant 0 : i32
    return %c0_i32, %c0_i32_0 : i32, i32
  }
  func.func @transform_1(%arg0: i32) -> (i32, i32) {
    %c0_i32 = arith.constant 0 : i32
    %c0_i32_0 = arith.constant 0 : i32
    return %c0_i32, %arg0 : i32, i32
  }
  func.func @transform_2(%arg0: i32) -> (i32, i32, i32) {
    %c0_i32 = arith.constant 0 : i32
    %c0_i32_0 = arith.constant 0 : i32
    %c0_i32_1 = arith.constant 0 : i32
    %c0_i32_2 = arith.constant 0 : i32
    return %c0_i32, %c0_i32_0, %c0_i32_1 : i32, i32, i32
  }
  func.func @transform_3(%arg0: i32) -> (i32, i32, i32) {
    %c0_i32 = arith.constant 0 : i32
    %c0_i32_0 = arith.constant 0 : i32
    %c0_i32_1 = arith.constant 0 : i32
    %c0_i32_2 = arith.constant 0 : i32
    return %c0_i32, %c0_i32_0, %c0_i32_1 : i32, i32, i32
  }
  func.func @transform_4(%arg0: i32) -> (i32, i32, i32) {
    %c0_i32 = arith.constant 0 : i32
    %c0_i32_0 = arith.constant 0 : i32
    %c0_i32_1 = arith.constant 0 : i32
    %c0_i32_2 = arith.constant 0 : i32
    return %c0_i32, %c0_i32_0, %c0_i32_1 : i32, i32, i32
  }
  func.func @transform_5(%arg0: i32) -> (i32, i32) {
    %c0_i32 = arith.constant 0 : i32
    %c0_i32_0 = arith.constant 0 : i32
    %c0_i32_1 = arith.constant 0 : i32
    return %c0_i32, %c0_i32_0 : i32, i32
  }
  func.func @transform_6(%arg0: i32) -> (i32, i32) {
    %c0_i32 = arith.constant 0 : i32
    %c0_i32_0 = arith.constant 0 : i32
    %c0_i32_1 = arith.constant 0 : i32
    return %c0_i32, %c0_i32_0 : i32, i32
  }
  func.func @transform_7(%arg0: i32) -> (i32, i32) {
    %c0_i32 = arith.constant 0 : i32
    %c0_i32_0 = arith.constant 0 : i32
    %c0_i32_1 = arith.constant 0 : i32
    return %c0_i32, %c0_i32_0 : i32, i32
  }
  func.func @transform_8(%arg0: i32) -> (i32, i32) {
    %c0_i32 = arith.constant 0 : i32
    %c0_i32_0 = arith.constant 0 : i32
    return %c0_i32, %arg0 : i32, i32
  }
}

module attributes {stable_mosaic.version = 11 : i64} {
  func.func @_stem_dag_reduce_kernel(%arg0: i32, %arg1: memref<2x3xf32, #tpu.memory_space<smem>>, %arg2: memref<36x512xbf16, #tpu.memory_space<vmem>>, %arg3: memref<8x36xbf16, #tpu.memory_space<vmem>>, %arg4: memref<8x1xf32, #tpu.memory_space<vmem>>, %arg5: memref<8x1xf32, #tpu.memory_space<vmem>>, %arg6: memref<2x8x8xbf16, #tpu.memory_space<vmem>>, %arg7: memref<2x8x1xf32, #tpu.memory_space<vmem>>, %arg8: memref<2x8x1xf32, #tpu.memory_space<vmem>>, %arg9: memref<16x16xbf16, #tpu.memory_space<vmem>>, %arg10: memref<16x1xf32, #tpu.memory_space<vmem>>, %arg11: memref<16x1xf32, #tpu.memory_space<vmem>>, %arg12: memref<16x128xf32, #tpu.memory_space<vmem>>) attributes {dimension_semantics = [#tpu.dimension_semantics<parallel>], iteration_bounds = array<i64: 1>, scalar_prefetch = 0 : i64, scratch_operands = 0 : i64, tpu.core_type = #tpu.core_type<tc>, window_params = [{transform_indices = @transform_0, window_bounds = array<i64: 2, 3>}, {transform_indices = @transform_1, window_bounds = array<i64: 36, 512>}, {pipeline_mode = #tpu.pipeline_mode<synchronous>, transform_indices = @transform_2, window_bounds = array<i64: 8, 36>}, {pipeline_mode = #tpu.pipeline_mode<synchronous>, transform_indices = @transform_3, window_bounds = array<i64: 8, 1>}, {pipeline_mode = #tpu.pipeline_mode<synchronous>, transform_indices = @transform_4, window_bounds = array<i64: 8, 1>}, {pipeline_mode = #tpu.pipeline_mode<synchronous>, transform_indices = @transform_5, window_bounds = array<i64: 2, 8, 8>}, {pipeline_mode = #tpu.pipeline_mode<synchronous>, transform_indices = @transform_6, window_bounds = array<i64: 2, 8, 1>}, {pipeline_mode = #tpu.pipeline_mode<synchronous>, transform_indices = @transform_7, window_bounds = array<i64: 2, 8, 1>}, {pipeline_mode = #tpu.pipeline_mode<synchronous>, transform_indices = @transform_8, window_bounds = array<i64: 16, 16>}, {pipeline_mode = #tpu.pipeline_mode<synchronous>, transform_indices = @transform_9, window_bounds = array<i64: 16, 1>}, {pipeline_mode = #tpu.pipeline_mode<synchronous>, transform_indices = @transform_10, window_bounds = array<i64: 16, 1>}, {transform_indices = @transform_11, window_bounds = array<i64: 16, 128>}]} {
    %c0 = arith.constant 0 : index
    %c0_0 = arith.constant 0 : index
    %0 = vector.load %arg3[%c0, %c0_0] : memref<8x36xbf16, #tpu.memory_space<vmem>>, vector<8x36xbf16>
    %c0_1 = arith.constant 0 : index
    %c0_2 = arith.constant 0 : index
    %1 = vector.load %arg2[%c0_1, %c0_2] : memref<36x512xbf16, #tpu.memory_space<vmem>>, vector<36x512xbf16>
    %cst = arith.constant dense<0.000000e+00> : vector<8x512xf32>
    %2 = tpu.matmul %0, %1, %cst {dimension_numbers = #tpu.dot_dimension_numbers<[1], [0], [0], [1], [0, 0, 1, 1], [], []>} : vector<8x36xbf16>, vector<36x512xbf16>, vector<8x512xf32> -> vector<8x512xf32>
    %c0_3 = arith.constant 0 : index
    %c0_4 = arith.constant 0 : index
    %3 = vector.load %arg4[%c0_3, %c0_4] : memref<8x1xf32, #tpu.memory_space<vmem>>, vector<8x1xf32>
    %4 = vector.broadcast %3 : vector<8x1xf32> to vector<8x512xf32>
    %5 = arith.mulf %2, %4 : vector<8x512xf32>
    %c0_5 = arith.constant 0 : index
    %c0_6 = arith.constant 0 : index
    %6 = vector.load %arg5[%c0_5, %c0_6] : memref<8x1xf32, #tpu.memory_space<vmem>>, vector<8x1xf32>
    %7 = vector.broadcast %6 : vector<8x1xf32> to vector<8x512xf32>
    %8 = arith.addf %5, %7 : vector<8x512xf32>
    %c0_7 = arith.constant 0 : index
    %c0_8 = arith.constant 0 : index
    %9 = memref.load %arg1[%c0_7, %c0_8] : memref<2x3xf32, #tpu.memory_space<smem>>
    %c0_9 = arith.constant 0 : index
    %c1 = arith.constant 1 : index
    %10 = memref.load %arg1[%c0_9, %c1] : memref<2x3xf32, #tpu.memory_space<smem>>
    %11 = vector.broadcast %9 : f32 to vector<8x512xf32>
    %12 = arith.mulf %11, %8 : vector<8x512xf32>
    %13 = vector.broadcast %10 : f32 to vector<8x512xf32>
    %14 = arith.mulf %13, %8 : vector<8x512xf32>
    %15 = arith.addf %12, %14 : vector<8x512xf32>
    %cst_10 = arith.constant 0.000000e+00 : f32
    %16 = vector.broadcast %cst_10 : f32 to vector<8x512xf32>
    %17 = arith.maximumf %15, %16 : vector<8x512xf32>
    %c0_11 = arith.constant 0 : index
    %c0_12 = arith.constant 0 : index
    %c0_13 = arith.constant 0 : index
    %18 = vector.load %arg6[%c0_11, %c0_12, %c0_13] : memref<2x8x8xbf16, #tpu.memory_space<vmem>>, vector<1x8x8xbf16>
    %19 = vector.shape_cast %18 : vector<1x8x8xbf16> to vector<8x8xbf16>
    %20 = arith.truncf %17 : vector<8x512xf32> to vector<8x512xbf16>
    %cst_14 = arith.constant dense<0.000000e+00> : vector<8x512xf32>
    %21 = tpu.matmul %19, %20, %cst_14 {dimension_numbers = #tpu.dot_dimension_numbers<[1], [0], [0], [1], [0, 0, 1, 1], [], []>} : vector<8x8xbf16>, vector<8x512xbf16>, vector<8x512xf32> -> vector<8x512xf32>
    %c0_15 = arith.constant 0 : index
    %c0_16 = arith.constant 0 : index
    %c0_17 = arith.constant 0 : index
    %22 = vector.load %arg7[%c0_15, %c0_16, %c0_17] : memref<2x8x1xf32, #tpu.memory_space<vmem>>, vector<1x8x1xf32>
    %23 = vector.shape_cast %22 : vector<1x8x1xf32> to vector<8x1xf32>
    %24 = vector.broadcast %23 : vector<8x1xf32> to vector<8x512xf32>
    %25 = arith.mulf %21, %24 : vector<8x512xf32>
    %c0_18 = arith.constant 0 : index
    %c0_19 = arith.constant 0 : index
    %c0_20 = arith.constant 0 : index
    %26 = vector.load %arg8[%c0_18, %c0_19, %c0_20] : memref<2x8x1xf32, #tpu.memory_space<vmem>>, vector<1x8x1xf32>
    %27 = vector.shape_cast %26 : vector<1x8x1xf32> to vector<8x1xf32>
    %28 = vector.broadcast %27 : vector<8x1xf32> to vector<8x512xf32>
    %29 = arith.addf %25, %28 : vector<8x512xf32>
    %c1_21 = arith.constant 1 : index
    %c0_22 = arith.constant 0 : index
    %30 = memref.load %arg1[%c1_21, %c0_22] : memref<2x3xf32, #tpu.memory_space<smem>>
    %c1_23 = arith.constant 1 : index
    %c1_24 = arith.constant 1 : index
    %31 = memref.load %arg1[%c1_23, %c1_24] : memref<2x3xf32, #tpu.memory_space<smem>>
    %c1_25 = arith.constant 1 : index
    %c2 = arith.constant 2 : index
    %32 = memref.load %arg1[%c1_25, %c2] : memref<2x3xf32, #tpu.memory_space<smem>>
    %33 = vector.broadcast %30 : f32 to vector<8x512xf32>
    %34 = arith.mulf %33, %8 : vector<8x512xf32>
    %35 = vector.broadcast %31 : f32 to vector<8x512xf32>
    %36 = arith.mulf %35, %8 : vector<8x512xf32>
    %37 = arith.addf %34, %36 : vector<8x512xf32>
    %38 = vector.broadcast %32 : f32 to vector<8x512xf32>
    %39 = arith.mulf %38, %29 : vector<8x512xf32>
    %40 = arith.addf %37, %39 : vector<8x512xf32>
    %cst_26 = arith.constant 0.000000e+00 : f32
    %41 = vector.broadcast %cst_26 : f32 to vector<8x512xf32>
    %42 = arith.maximumf %40, %41 : vector<8x512xf32>
    %c1_27 = arith.constant 1 : index
    %c0_28 = arith.constant 0 : index
    %c0_29 = arith.constant 0 : index
    %43 = vector.load %arg6[%c1_27, %c0_28, %c0_29] : memref<2x8x8xbf16, #tpu.memory_space<vmem>>, vector<1x8x8xbf16>
    %44 = vector.shape_cast %43 : vector<1x8x8xbf16> to vector<8x8xbf16>
    %45 = arith.truncf %42 : vector<8x512xf32> to vector<8x512xbf16>
    %cst_30 = arith.constant dense<0.000000e+00> : vector<8x512xf32>
    %46 = tpu.matmul %44, %45, %cst_30 {dimension_numbers = #tpu.dot_dimension_numbers<[1], [0], [0], [1], [0, 0, 1, 1], [], []>} : vector<8x8xbf16>, vector<8x512xbf16>, vector<8x512xf32> -> vector<8x512xf32>
    %c1_31 = arith.constant 1 : index
    %c0_32 = arith.constant 0 : index
    %c0_33 = arith.constant 0 : index
    %47 = vector.load %arg7[%c1_31, %c0_32, %c0_33] : memref<2x8x1xf32, #tpu.memory_space<vmem>>, vector<1x8x1xf32>
    %48 = vector.shape_cast %47 : vector<1x8x1xf32> to vector<8x1xf32>
    %49 = vector.broadcast %48 : vector<8x1xf32> to vector<8x512xf32>
    %50 = arith.mulf %46, %49 : vector<8x512xf32>
    %c1_34 = arith.constant 1 : index
    %c0_35 = arith.constant 0 : index
    %c0_36 = arith.constant 0 : index
    %51 = vector.load %arg8[%c1_34, %c0_35, %c0_36] : memref<2x8x1xf32, #tpu.memory_space<vmem>>, vector<1x8x1xf32>
    %52 = vector.shape_cast %51 : vector<1x8x1xf32> to vector<8x1xf32>
    %53 = vector.broadcast %52 : vector<8x1xf32> to vector<8x512xf32>
    %54 = arith.addf %50, %53 : vector<8x512xf32>
    %55 = vector.extract_strided_slice %29 {offsets = [0, 0], sizes = [8, 64], strides = [1, 1]} : vector<8x512xf32> to vector<8x64xf32>
    %56 = vector.extract_strided_slice %54 {offsets = [0, 0], sizes = [8, 64], strides = [1, 1]} : vector<8x512xf32> to vector<8x64xf32>
    %57 = tpu.concatenate %55, %56 in 0 : vector<8x64xf32>, vector<8x64xf32> -> vector<16x64xf32>
    %58 = vector.extract_strided_slice %29 {offsets = [0, 256], sizes = [8, 64], strides = [1, 1]} : vector<8x512xf32> to vector<8x64xf32>
    %59 = vector.extract_strided_slice %54 {offsets = [0, 256], sizes = [8, 64], strides = [1, 1]} : vector<8x512xf32> to vector<8x64xf32>
    %60 = tpu.concatenate %58, %59 in 0 : vector<8x64xf32>, vector<8x64xf32> -> vector<16x64xf32>
    %61 = tpu.concatenate %57, %60 in 1 : vector<16x64xf32>, vector<16x64xf32> -> vector<16x128xf32>
    %cst_37 = arith.constant 0.000000e+00 : f32
    %62 = vector.broadcast %cst_37 : f32 to vector<16x128xf32>
    %63 = arith.maximumf %61, %62 : vector<16x128xf32>
    %c0_38 = arith.constant 0 : index
    %c0_39 = arith.constant 0 : index
    %64 = vector.load %arg9[%c0_38, %c0_39] : memref<16x16xbf16, #tpu.memory_space<vmem>>, vector<16x16xbf16>
    %65 = arith.truncf %63 : vector<16x128xf32> to vector<16x128xbf16>
    %cst_40 = arith.constant dense<0.000000e+00> : vector<16x128xf32>
    %66 = tpu.matmul %64, %65, %cst_40 {dimension_numbers = #tpu.dot_dimension_numbers<[1], [0], [0], [1], [0, 0, 1, 1], [], []>} : vector<16x16xbf16>, vector<16x128xbf16>, vector<16x128xf32> -> vector<16x128xf32>
    %c0_41 = arith.constant 0 : index
    %c0_42 = arith.constant 0 : index
    %67 = vector.load %arg10[%c0_41, %c0_42] : memref<16x1xf32, #tpu.memory_space<vmem>>, vector<16x1xf32>
    %68 = vector.broadcast %67 : vector<16x1xf32> to vector<16x128xf32>
    %69 = arith.mulf %66, %68 : vector<16x128xf32>
    %c0_43 = arith.constant 0 : index
    %c0_44 = arith.constant 0 : index
    %70 = vector.load %arg11[%c0_43, %c0_44] : memref<16x1xf32, #tpu.memory_space<vmem>>, vector<16x1xf32>
    %71 = vector.broadcast %70 : vector<16x1xf32> to vector<16x128xf32>
    %72 = arith.addf %69, %71 : vector<16x128xf32>
    %c0_45 = arith.constant 0 : index
    %c0_46 = arith.constant 0 : index
    %73 = vector.load %arg12[%c0_45, %c0_46] : memref<16x128xf32, #tpu.memory_space<vmem>>, vector<16x128xf32>
    tpu.vector_store %arg12[%c0_45, %c0_46], %72 {strides = array<i32>} : memref<16x128xf32, #tpu.memory_space<vmem>>, vector<16x128xf32>,
    return
  }
  func.func @transform_0(%arg0: i32) -> (i32, i32) {
    %c0_i32 = arith.constant 0 : i32
    %c0_i32_0 = arith.constant 0 : i32
    %c0_i32_1 = arith.constant 0 : i32
    return %c0_i32, %c0_i32_0 : i32, i32
  }
  func.func @transform_1(%arg0: i32) -> (i32, i32) {
    %c0_i32 = arith.constant 0 : i32
    %c0_i32_0 = arith.constant 0 : i32
    return %c0_i32, %arg0 : i32, i32
  }
  func.func @transform_2(%arg0: i32) -> (i32, i32) {
    %c0_i32 = arith.constant 0 : i32
    %c0_i32_0 = arith.constant 0 : i32
    %c0_i32_1 = arith.constant 0 : i32
    return %c0_i32, %c0_i32_0 : i32, i32
  }
  func.func @transform_3(%arg0: i32) -> (i32, i32) {
    %c0_i32 = arith.constant 0 : i32
    %c0_i32_0 = arith.constant 0 : i32
    %c0_i32_1 = arith.constant 0 : i32
    return %c0_i32, %c0_i32_0 : i32, i32
  }
  func.func @transform_4(%arg0: i32) -> (i32, i32) {
    %c0_i32 = arith.constant 0 : i32
    %c0_i32_0 = arith.constant 0 : i32
    %c0_i32_1 = arith.constant 0 : i32
    return %c0_i32, %c0_i32_0 : i32, i32
  }
  func.func @transform_5(%arg0: i32) -> (i32, i32, i32) {
    %c0_i32 = arith.constant 0 : i32
    %c0_i32_0 = arith.constant 0 : i32
    %c0_i32_1 = arith.constant 0 : i32
    %c0_i32_2 = arith.constant 0 : i32
    return %c0_i32, %c0_i32_0, %c0_i32_1 : i32, i32, i32
  }
  func.func @transform_6(%arg0: i32) -> (i32, i32, i32) {
    %c0_i32 = arith.constant 0 : i32
    %c0_i32_0 = arith.constant 0 : i32
    %c0_i32_1 = arith.constant 0 : i32
    %c0_i32_2 = arith.constant 0 : i32
    return %c0_i32, %c0_i32_0, %c0_i32_1 : i32, i32, i32
  }
  func.func @transform_7(%arg0: i32) -> (i32, i32, i32) {
    %c0_i32 = arith.constant 0 : i32
    %c0_i32_0 = arith.constant 0 : i32
    %c0_i32_1 = arith.constant 0 : i32
    %c0_i32_2 = arith.constant 0 : i32
    return %c0_i32, %c0_i32_0, %c0_i32_1 : i32, i32, i32
  }
  func.func @transform_8(%arg0: i32) -> (i32, i32) {
    %c0_i32 = arith.constant 0 : i32
    %c0_i32_0 = arith.constant 0 : i32
    %c0_i32_1 = arith.constant 0 : i32
    return %c0_i32, %c0_i32_0 : i32, i32
  }
  func.func @transform_9(%arg0: i32) -> (i32, i32) {
    %c0_i32 = arith.constant 0 : i32
    %c0_i32_0 = arith.constant 0 : i32
    %c0_i32_1 = arith.constant 0 : i32
    return %c0_i32, %c0_i32_0 : i32, i32
  }
  func.func @transform_10(%arg0: i32) -> (i32, i32) {
    %c0_i32 = arith.constant 0 : i32
    %c0_i32_0 = arith.constant 0 : i32
    %c0_i32_1 = arith.constant 0 : i32
    return %c0_i32, %c0_i32_0 : i32, i32
  }
  func.func @transform_11(%arg0: i32) -> (i32, i32) {
    %c0_i32 = arith.constant 0 : i32
    %c0_i32_0 = arith.constant 0 : i32
    return %c0_i32, %arg0 : i32, i32
  }
}

module attributes {stable_mosaic.version = 11 : i64} {
  func.func @_dag_head_kernel(%arg0: i32, %arg1: memref<2x3xf32, #tpu.memory_space<smem>>, %arg2: memref<32x32xf32, #tpu.memory_space<vmem>>, %arg3: memref<2x32x32xbf16, #tpu.memory_space<vmem>>, %arg4: memref<2x32x1xf32, #tpu.memory_space<vmem>>, %arg5: memref<2x32x1xf32, #tpu.memory_space<vmem>>, %arg6: memref<10x64xf32, #tpu.memory_space<vmem>>, %arg7: memref<10x1xf32, #tpu.memory_space<vmem>>, %arg8: memref<10x2xf32, #tpu.memory_space<vmem>>) attributes {dimension_semantics = [#tpu.dimension_semantics<parallel>], iteration_bounds = array<i64: 1>, scalar_prefetch = 0 : i64, scratch_operands = 0 : i64, tpu.core_type = #tpu.core_type<tc>, window_params = [{transform_indices = @transform_0, window_bounds = array<i64: 2, 3>}, {transform_indices = @transform_1, window_bounds = array<i64: 32, 32>}, {pipeline_mode = #tpu.pipeline_mode<synchronous>, transform_indices = @transform_2, window_bounds = array<i64: 2, 32, 32>}, {pipeline_mode = #tpu.pipeline_mode<synchronous>, transform_indices = @transform_3, window_bounds = array<i64: 2, 32, 1>}, {pipeline_mode = #tpu.pipeline_mode<synchronous>, transform_indices = @transform_4, window_bounds = array<i64: 2, 32, 1>}, {pipeline_mode = #tpu.pipeline_mode<synchronous>, transform_indices = @transform_5, window_bounds = array<i64: 10, 64>}, {pipeline_mode = #tpu.pipeline_mode<synchronous>, transform_indices = @transform_6, window_bounds = array<i64: 10, 1>}, {transform_indices = @transform_7, window_bounds = array<i64: 10, 2>}]} {
    %c0 = arith.constant 0 : index
    %c0_0 = arith.constant 0 : index
    %0 = vector.load %arg2[%c0, %c0_0] : memref<32x32xf32, #tpu.memory_space<vmem>>, vector<32x32xf32>
    %c0_1 = arith.constant 0 : index
    %c0_2 = arith.constant 0 : index
    %1 = memref.load %arg1[%c0_1, %c0_2] : memref<2x3xf32, #tpu.memory_space<smem>>
    %c0_3 = arith.constant 0 : index
    %c1 = arith.constant 1 : index
    %2 = memref.load %arg1[%c0_3, %c1] : memref<2x3xf32, #tpu.memory_space<smem>>
    %3 = vector.broadcast %1 : f32 to vector<32x32xf32>
    %4 = arith.mulf %3, %0 : vector<32x32xf32>
    %5 = vector.broadcast %2 : f32 to vector<32x32xf32>
    %6 = arith.mulf %5, %0 : vector<32x32xf32>
    %7 = arith.addf %4, %6 : vector<32x32xf32>
    %cst = arith.constant 0.000000e+00 : f32
    %8 = vector.broadcast %cst : f32 to vector<32x32xf32>
    %9 = arith.maximumf %7, %8 : vector<32x32xf32>
    %c0_4 = arith.constant 0 : index
    %c0_5 = arith.constant 0 : index
    %c0_6 = arith.constant 0 : index
    %10 = vector.load %arg3[%c0_4, %c0_5, %c0_6] : memref<2x32x32xbf16, #tpu.memory_space<vmem>>, vector<1x32x32xbf16>
    %11 = vector.shape_cast %10 : vector<1x32x32xbf16> to vector<32x32xbf16>
    %12 = arith.truncf %9 : vector<32x32xf32> to vector<32x32xbf16>
    %cst_7 = arith.constant dense<0.000000e+00> : vector<32x32xf32>
    %13 = tpu.matmul %11, %12, %cst_7 {dimension_numbers = #tpu.dot_dimension_numbers<[1], [0], [0], [1], [0, 0, 1, 1], [], []>} : vector<32x32xbf16>, vector<32x32xbf16>, vector<32x32xf32> -> vector<32x32xf32>
    %c0_8 = arith.constant 0 : index
    %c0_9 = arith.constant 0 : index
    %c0_10 = arith.constant 0 : index
    %14 = vector.load %arg4[%c0_8, %c0_9, %c0_10] : memref<2x32x1xf32, #tpu.memory_space<vmem>>, vector<1x32x1xf32>
    %15 = vector.shape_cast %14 : vector<1x32x1xf32> to vector<32x1xf32>
    %16 = vector.broadcast %15 : vector<32x1xf32> to vector<32x32xf32>
    %17 = arith.mulf %13, %16 : vector<32x32xf32>
    %c0_11 = arith.constant 0 : index
    %c0_12 = arith.constant 0 : index
    %c0_13 = arith.constant 0 : index
    %18 = vector.load %arg5[%c0_11, %c0_12, %c0_13] : memref<2x32x1xf32, #tpu.memory_space<vmem>>, vector<1x32x1xf32>
    %19 = vector.shape_cast %18 : vector<1x32x1xf32> to vector<32x1xf32>
    %20 = vector.broadcast %19 : vector<32x1xf32> to vector<32x32xf32>
    %21 = arith.addf %17, %20 : vector<32x32xf32>
    %c1_14 = arith.constant 1 : index
    %c0_15 = arith.constant 0 : index
    %22 = memref.load %arg1[%c1_14, %c0_15] : memref<2x3xf32, #tpu.memory_space<smem>>
    %c1_16 = arith.constant 1 : index
    %c1_17 = arith.constant 1 : index
    %23 = memref.load %arg1[%c1_16, %c1_17] : memref<2x3xf32, #tpu.memory_space<smem>>
    %c1_18 = arith.constant 1 : index
    %c2 = arith.constant 2 : index
    %24 = memref.load %arg1[%c1_18, %c2] : memref<2x3xf32, #tpu.memory_space<smem>>
    %25 = vector.broadcast %22 : f32 to vector<32x32xf32>
    %26 = arith.mulf %25, %0 : vector<32x32xf32>
    %27 = vector.broadcast %23 : f32 to vector<32x32xf32>
    %28 = arith.mulf %27, %0 : vector<32x32xf32>
    %29 = arith.addf %26, %28 : vector<32x32xf32>
    %30 = vector.broadcast %24 : f32 to vector<32x32xf32>
    %31 = arith.mulf %30, %21 : vector<32x32xf32>
    %32 = arith.addf %29, %31 : vector<32x32xf32>
    %cst_19 = arith.constant 0.000000e+00 : f32
    %33 = vector.broadcast %cst_19 : f32 to vector<32x32xf32>
    %34 = arith.maximumf %32, %33 : vector<32x32xf32>
    %c1_20 = arith.constant 1 : index
    %c0_21 = arith.constant 0 : index
    %c0_22 = arith.constant 0 : index
    %35 = vector.load %arg3[%c1_20, %c0_21, %c0_22] : memref<2x32x32xbf16, #tpu.memory_space<vmem>>, vector<1x32x32xbf16>
    %36 = vector.shape_cast %35 : vector<1x32x32xbf16> to vector<32x32xbf16>
    %37 = arith.truncf %34 : vector<32x32xf32> to vector<32x32xbf16>
    %cst_23 = arith.constant dense<0.000000e+00> : vector<32x32xf32>
    %38 = tpu.matmul %36, %37, %cst_23 {dimension_numbers = #tpu.dot_dimension_numbers<[1], [0], [0], [1], [0, 0, 1, 1], [], []>} : vector<32x32xbf16>, vector<32x32xbf16>, vector<32x32xf32> -> vector<32x32xf32>
    %c1_24 = arith.constant 1 : index
    %c0_25 = arith.constant 0 : index
    %c0_26 = arith.constant 0 : index
    %39 = vector.load %arg4[%c1_24, %c0_25, %c0_26] : memref<2x32x1xf32, #tpu.memory_space<vmem>>, vector<1x32x1xf32>
    %40 = vector.shape_cast %39 : vector<1x32x1xf32> to vector<32x1xf32>
    %41 = vector.broadcast %40 : vector<32x1xf32> to vector<32x32xf32>
    %42 = arith.mulf %38, %41 : vector<32x32xf32>
    %c1_27 = arith.constant 1 : index
    %c0_28 = arith.constant 0 : index
    %c0_29 = arith.constant 0 : index
    %43 = vector.load %arg5[%c1_27, %c0_28, %c0_29] : memref<2x32x1xf32, #tpu.memory_space<vmem>>, vector<1x32x1xf32>
    %44 = vector.shape_cast %43 : vector<1x32x1xf32> to vector<32x1xf32>
    %45 = vector.broadcast %44 : vector<32x1xf32> to vector<32x32xf32>
    %46 = arith.addf %42, %45 : vector<32x32xf32>
    %47 = vector.extract_strided_slice %21 {offsets = [0, 0], sizes = [32, 16], strides = [1, 1]} : vector<32x32xf32> to vector<32x16xf32>
    %cst_30 = arith.constant dense<0.000000e+00> : vector<32xf32>
    %48 = vector.multi_reduction <add>, %47, %cst_30 [1] : vector<32x16xf32> to vector<32xf32>
    %49 = vector.shape_cast %48 : vector<32xf32> to vector<32x1xf32>
    %cst_31 = arith.constant 6.250000e-02 : f32
    %50 = vector.broadcast %cst_31 : f32 to vector<32x1xf32>
    %51 = arith.mulf %49, %50 : vector<32x1xf32>
    %52 = vector.extract_strided_slice %46 {offsets = [0, 0], sizes = [32, 16], strides = [1, 1]} : vector<32x32xf32> to vector<32x16xf32>
    %cst_32 = arith.constant dense<0.000000e+00> : vector<32xf32>
    %53 = vector.multi_reduction <add>, %52, %cst_32 [1] : vector<32x16xf32> to vector<32xf32>
    %54 = vector.shape_cast %53 : vector<32xf32> to vector<32x1xf32>
    %cst_33 = arith.constant 6.250000e-02 : f32
    %55 = vector.broadcast %cst_33 : f32 to vector<32x1xf32>
    %56 = arith.mulf %54, %55 : vector<32x1xf32>
    %57 = tpu.concatenate %51, %56 in 0 : vector<32x1xf32>, vector<32x1xf32> -> vector<64x1xf32>
    %58 = vector.extract_strided_slice %21 {offsets = [0, 16], sizes = [32, 16], strides = [1, 1]} : vector<32x32xf32> to vector<32x16xf32>
    %cst_34 = arith.constant dense<0.000000e+00> : vector<32xf32>
    %59 = vector.multi_reduction <add>, %58, %cst_34 [1] : vector<32x16xf32> to vector<32xf32>
    %60 = vector.shape_cast %59 : vector<32xf32> to vector<32x1xf32>
    %cst_35 = arith.constant 6.250000e-02 : f32
    %61 = vector.broadcast %cst_35 : f32 to vector<32x1xf32>
    %62 = arith.mulf %60, %61 : vector<32x1xf32>
    %63 = vector.extract_strided_slice %46 {offsets = [0, 16], sizes = [32, 16], strides = [1, 1]} : vector<32x32xf32> to vector<32x16xf32>
    %cst_36 = arith.constant dense<0.000000e+00> : vector<32xf32>
    %64 = vector.multi_reduction <add>, %63, %cst_36 [1] : vector<32x16xf32> to vector<32xf32>
    %65 = vector.shape_cast %64 : vector<32xf32> to vector<32x1xf32>
    %cst_37 = arith.constant 6.250000e-02 : f32
    %66 = vector.broadcast %cst_37 : f32 to vector<32x1xf32>
    %67 = arith.mulf %65, %66 : vector<32x1xf32>
    %68 = tpu.concatenate %62, %67 in 0 : vector<32x1xf32>, vector<32x1xf32> -> vector<64x1xf32>
    %69 = tpu.concatenate %57, %68 in 1 : vector<64x1xf32>, vector<64x1xf32> -> vector<64x2xf32>
    %c0_38 = arith.constant 0 : index
    %c0_39 = arith.constant 0 : index
    %70 = vector.load %arg6[%c0_38, %c0_39] : memref<10x64xf32, #tpu.memory_space<vmem>>, vector<10x64xf32>
    %cst_40 = arith.constant dense<0.000000e+00> : vector<10x2xf32>
    %71 = tpu.matmul %70, %69, %cst_40 {dimension_numbers = #tpu.dot_dimension_numbers<[1], [0], [0], [1], [0, 0, 1, 1], [], []>} : vector<10x64xf32>, vector<64x2xf32>, vector<10x2xf32> -> vector<10x2xf32>
    %c0_41 = arith.constant 0 : index
    %c0_42 = arith.constant 0 : index
    %72 = vector.load %arg7[%c0_41, %c0_42] : memref<10x1xf32, #tpu.memory_space<vmem>>, vector<10x1xf32>
    %73 = vector.broadcast %72 : vector<10x1xf32> to vector<10x2xf32>
    %74 = arith.addf %71, %73 : vector<10x2xf32>
    %c0_43 = arith.constant 0 : index
    %c0_44 = arith.constant 0 : index
    %75 = vector.load %arg8[%c0_43, %c0_44] : memref<10x2xf32, #tpu.memory_space<vmem>>, vector<10x2xf32>
    tpu.vector_store %arg8[%c0_43, %c0_44], %74 {strides = array<i32>} : memref<10x2xf32, #tpu.memory_space<vmem>>, vector<10x2xf32>,
    return
  }
  func.func @transform_0(%arg0: i32) -> (i32, i32) {
    %c0_i32 = arith.constant 0 : i32
    %c0_i32_0 = arith.constant 0 : i32
    %c0_i32_1 = arith.constant 0 : i32
    return %c0_i32, %c0_i32_0 : i32, i32
  }
  func.func @transform_1(%arg0: i32) -> (i32, i32) {
    %c0_i32 = arith.constant 0 : i32
    %c0_i32_0 = arith.constant 0 : i32
    return %c0_i32, %arg0 : i32, i32
  }
  func.func @transform_2(%arg0: i32) -> (i32, i32, i32) {
    %c0_i32 = arith.constant 0 : i32
    %c0_i32_0 = arith.constant 0 : i32
    %c0_i32_1 = arith.constant 0 : i32
    %c0_i32_2 = arith.constant 0 : i32
    return %c0_i32, %c0_i32_0, %c0_i32_1 : i32, i32, i32
  }
  func.func @transform_3(%arg0: i32) -> (i32, i32, i32) {
    %c0_i32 = arith.constant 0 : i32
    %c0_i32_0 = arith.constant 0 : i32
    %c0_i32_1 = arith.constant 0 : i32
    %c0_i32_2 = arith.constant 0 : i32
    return %c0_i32, %c0_i32_0, %c0_i32_1 : i32, i32, i32
  }
  func.func @transform_4(%arg0: i32) -> (i32, i32, i32) {
    %c0_i32 = arith.constant 0 : i32
    %c0_i32_0 = arith.constant 0 : i32
    %c0_i32_1 = arith.constant 0 : i32
    %c0_i32_2 = arith.constant 0 : i32
    return %c0_i32, %c0_i32_0, %c0_i32_1 : i32, i32, i32
  }
  func.func @transform_5(%arg0: i32) -> (i32, i32) {
    %c0_i32 = arith.constant 0 : i32
    %c0_i32_0 = arith.constant 0 : i32
    %c0_i32_1 = arith.constant 0 : i32
    return %c0_i32, %c0_i32_0 : i32, i32
  }
  func.func @transform_6(%arg0: i32) -> (i32, i32) {
    %c0_i32 = arith.constant 0 : i32
    %c0_i32_0 = arith.constant 0 : i32
    %c0_i32_1 = arith.constant 0 : i32
    return %c0_i32, %c0_i32_0 : i32, i32
  }
  func.func @transform_7(%arg0: i32) -> (i32, i32) {
    %c0_i32 = arith.constant 0 : i32
    %c0_i32_0 = arith.constant 0 : i32
    return %c0_i32, %arg0 : i32, i32
  }
}

</mosaic_0001>

<bundles_post_ra>
// kernel: _lambda_.3
= control target key start
LH: loop header
LB: loop body
LE: loop exit
PB: predicated region body
PF: predicated region fallthrough
CT: control target
= control target key end

     0   :  { %16 = vsyncpa [#allocation3], 0  ;;  %s427_s20 = smov [#allocation2]   ;;  %s579_s0 = inlined_call_operand.vmem [shape: f32[2,3], index: 0, kind: input, shape index: {}]   ;;  %s580_s1 = inlined_call_operand.vmem [shape: bf16[36,512], index: 1, kind: input, shape index: {}]   ;;  %s581_s2 = inlined_call_operand.vmem [shape: bf16[8,36], index: 2, kind: input, shape index: {}]   ;;  %s582_s3 = inlined_call_operand.vmem [shape: f32[8,1], index: 3, kind: input, shape index: {}]   ;;  %s583_s4 = inlined_call_operand.vmem [shape: f32[8,1], index: 4, kind: input, shape index: {}]   ;;  %s584_s5 = inlined_call_operand.vmem [shape: bf16[2,8,8], index: 5, kind: input, shape index: {}]   ;;  %s585_s6 = inlined_call_operand.vmem [shape: f32[2,8,1], index: 6, kind: input, shape index: {}]   ;;  %s586_s7 = inlined_call_operand.vmem [shape: f32[2,8,1], index: 7, kind: input, shape index: {}]   ;;  %s587_s8 = inlined_call_operand.vmem [shape: bf16[16,16], index: 8, kind: input, shape index: {}]   ;;  %s588_s9 = inlined_call_operand.vmem [shape: f32[16,1], index: 9, kind: input, shape index: {}]   ;;  %s589_s10 = inlined_call_operand.vmem [shape: f32[16,1], index: 10, kind: input, shape index: {}]   ;;  %s590_s11 = inlined_call_operand.vmem [shape: f32[16,128], index: 11, kind: output, shape index: {}]  }
   0x1   :  { %s22_s19 = sshll.u32 %s579_s0, 4  ;;  %s23_s19 = int_to_ptr.vmem [resolvable:$true] %s22_s19 }
   0x2   :  { %25 = dma.vmem_to_smem %s23_s19, 32, %s427_s20, [#allocation3]  }
   0x3   :  { %425 = dma.done.wait [#allocation3], 32  }
   0x4   :  { %426 = vsyncadd [#allocation3], 4294967264 }
   0x5   :  { %50 = sfence }
   0x6   :  { %v61_v0 = vld [vmem:[%s580_s1 + $0x40] sm:$0x3]  ;;  %v62_v1 = vld [vmem:[%s580_s1 + $0x48] sm:$0x3]  ;;  %v428_v4 = vmov 0   ;;  %vm97_vm0 = vcmask 1041408  }
   0x7   :  { %v81_v2 = vunpack.c.l.b16 %v61_v0  ;;  %v82_v3 = vunpack.c.l.b16 %v62_v1  ;;  %405 = vset.pattern.permute.xlu0 %v428_v4  ;;  %406 = vset.pattern.permute.xlu1 %v428_v4  ;;  %v373_v5 = vld [vmem:[%s580_s1 + $0x20] sm:$0xf]  ;;  %v399_v9 = vld [vmem:[%s580_s1 + $0x2c] sm:$0xf0]  ;;  %v377_v10 = vld [vmem:[%s580_s1 + $0x28] sm:$0xf] }
   0x8   :  { %v130_v6 = vld [vmem:[%s582_s3] sm:$0xff]  ;;  %407 = vset.pattern.permute.xlu2 %v428_v4  ;;  %v400_v11 = vld [vmem:[%s580_s1 + $0x34] sm:$0xf0]  ;;  %v374_v14 = vor.u32 %v399_v9, %v373_v5  ;;  %v397_v17 = vld [vmem:[%s580_s1 + $0xc] sm:$0xf0]  ;;  %vm93_vm1 = vcmask 293888  }
   0x9   :  { %v87_v7 = vpack.c.b16 %v81_v2, %v81_v2  ;;  %v88_v8 = vpack.c.b16 %v82_v3, %v82_v3  ;;  %133 = vperm.xlu0 %405, %v130_v6   ;;  %v378_v15 = vor.u32 %v400_v11, %v377_v10  ;;  %v365_v16 = vld [vmem:[%s580_s1] sm:$0xf]  ;;  %v369_v18 = vld [vmem:[%s580_s1 + $0x8] sm:$0xf]  ;;  %v398_v19 = vld [vmem:[%s580_s1 + $0x14] sm:$0xf0] }
   0xa   :  { %v138_v20 = vld [vmem:[%s583_s4] sm:$0xff]  ;;  %v366_v21 = vor.u32 %v397_v17, %v365_v16  ;;  %v370_v22 = vor.u32 %v398_v19, %v369_v18  ;;  %v343_v28 = vld [vmem:[%s589_s10 + $0x8] sm:$0xff]  ;;  %s381_s12 = sld [smem:[#allocation2 + $0x1]]  ;;  %vm165_vm2 = vcmask 1043456   ;;  %vm161_vm3 = vcmask 64512  }
   0xb   :  { %v99_v12 = vsel %vm97_vm0, %v87_v7, 0  ;;  %v102_v13 = vsel %vm97_vm0, %v88_v8, 0  ;;  %v52_v23 = vld [vmem:[%s581_s2] sm:$0xf]  ;;  %s146_s2 = sld [smem:[#allocation2]]  ;;  %v390_v53 = vld [vmem:[%s585_s6 + $0x8] sm:$0xff] }
   0xc   :  { %109 = vmatpush.bf16.msra.mxu0 %v99_v12  ;;  %122 = vmatpush.bf16.msra.mxu1 %v102_v13  ;;  %v198_v24 = vld [vmem:[%s585_s6] sm:$0xff]  ;;  %s384_s16 = sld [smem:[#allocation2 + $0x80]]  ;;  %v391_v54 = vld [vmem:[%s586_s7 + $0x8] sm:$0xff]  ;;  %vm297_vm4 = vcmask 523264   ;;  %vm310_vm5 = vcmask 130048  }
   0xd   :  { %201 = vperm.xlu1 %406, %v198_v24   ;;  %v206_v25 = vld [vmem:[%s586_s7] sm:$0xff]  ;;  %275 = vperm.xlu2 %407, %v390_v53   ;;  %s385_s17 = sld [smem:[#allocation2 + $0x81]]  ;;  %v329_v58 = vld [vmem:[%s588_s9 + $0x8] sm:$0xff] }
   0xe   :  { %v328_v26 = vld [vmem:[%s588_s9] sm:$0xff]  ;;  %s386_s20 = sld [smem:[#allocation2 + $0x82]]  ;;  %s429_s9 = smov 64  }
   0xf   :  { %v158_v52 = vld [vmem:[%s584_s5] sm:$0xf] }
  0x10   :  { %110 = vmatpush.bf16.msra.mxu0 %v374_v14  ;;  %123 = vmatpush.bf16.msra.mxu1 %v378_v15  ;;  %v151_v35 = vstv %s381_s12 }
  0x11   :  { %141 = vperm.xlu0 %405, %v138_v20   ;;  %v148_v34 = vstv %s146_s2 }
  0x12   :  { %v217_v56 = vstv %s384_s16 }
  0x13   :  { %v220_v57 = vstv %s385_s17 }
  0x14   :  { %111 = vmatpush.bf16.msra.mxu0 %v366_v21  ;;  %124 = vmatpush.bf16.msra.mxu1 %v370_v22  ;;  %v225_v4 = vstv %s386_s20  ;;  %v387_v21 = vld [vmem:[%s584_s5 + $0x4] sm:$0xf] }
  0x15   :  { %209 = vperm.xlu1 %406, %v206_v25   ;;  %284 = vperm.xlu2 %407, %v391_v54  }
  0x17   :  { %379 = vmatmul.msk.bf16.vlgmr.msra.gmra.mxu0 %vm93_vm1, %v52_v23  ;;  %380 = vmatmul.msk.bf16.vlgmr.msra.gmra.mxu1 %vm93_vm1, %v52_v23 }
  0x1d   :  { %332 = vperm.xlu1 %406, %v328_v26   ;;  %337 = vperm.xlu2 %407, %v329_v58  }
  0x25   :  { %351 = vperm.xlu1 %406, %v343_v28  }
  0x67   :  { %v276_v22 = vpop.permute.xlu2 %275 }
  0x7b   :  { %v134_v27 = vpop.permute.xlu0 %133 }
  0x7f   :  { %v202_v55 = vpop.permute.xlu1 %201 }
  0x83   :  { %v142_v33 = vpop.permute.xlu0 %141 }
  0x87   :  { %v210_v3 = vpop.permute.xlu1 %209 }
  0x94   :  { %v113_v29 = vpop.f32.mrf.mxu0  ;;  %v126_v30 = vpop.f32.mrf.mxu1 }
  0x95   :  { %v136_v31 = vmul.f32 %v134_v27, %v113_v29  ;;  %v137_v32 = vmul.f32 %v134_v27, %v126_v30  ;;  %v285_v27 = vpop.permute.xlu2 %284 }
  0x97   :  { %v144_v36 = vadd.f32 %v142_v33, %v136_v31  ;;  %v145_v37 = vadd.f32 %v142_v33, %v137_v32  ;;  %v342_v33 = vld [vmem:[%s589_s10] sm:$0xff] }
  0x99   :  { %v149_v38 = vmul.f32 %v148_v34, %v144_v36  ;;  %v152_v39 = vmul.f32 %v151_v35, %v144_v36  ;;  %v150_v40 = vmul.f32 %v148_v34, %v145_v37  ;;  %v153_v41 = vmul.f32 %v151_v35, %v145_v37 }
  0x9a   :  { %v218_v61 = vmul.f32 %v217_v56, %v144_v36  ;;  %v221_v62 = vmul.f32 %v220_v57, %v144_v36  ;;  %v219_v1 = vmul.f32 %v217_v56, %v145_v37  ;;  %v222_v2 = vmul.f32 %v220_v57, %v145_v37 }
  0x9b   :  { %v154_v42 = vadd.f32 %v152_v39, %v149_v38  ;;  %v155_v43 = vadd.f32 %v153_v41, %v150_v40 }
  0x9c   :  { %v128_v44 = vpop.f32.mrf.mxu1  ;;  %v115_v45 = vpop.f32.mrf.mxu0  ;;  %v223_v9 = vadd.f32 %v221_v62, %v218_v61  ;;  %v224_v10 = vadd.f32 %v222_v2, %v219_v1 }
  0x9d   :  { %v156_v46 = vmax.f32 %v154_v42, 0.0  ;;  %v157_v47 = vmax.f32 %v155_v43, 0.0  ;;  %v401_v42 = vld [vmem:[%s587_s8] sm:$0xff]  ;;  %v333_v43 = vpop.permute.xlu1 %332 }
  0x9f   :  { %v159_v48 = vpack.c.bf16 %v156_v46, %v156_v46  ;;  %v160_v49 = vpack.c.bf16 %v157_v47, %v157_v47 }
  0xa1   :  { %v167_v50 = vsel %vm165_vm2, %v159_v48, 0  ;;  %v170_v51 = vsel %vm165_vm2, %v160_v49, 0  ;;  %v338_v48 = vpop.permute.xlu2 %337 }
  0xa2   :  { %179 = vmatpush.bf16.msra.mxu2 %v167_v50  ;;  %192 = vmatpush.bf16.msra.mxu3 %v170_v51 }
  0xa5   :  { %382 = vmatmul.msk.bf16.vlgmr.msra.gmra.mxu2 %vm161_vm3, %v158_v52  ;;  %383 = vmatmul.msk.bf16.vlgmr.msra.gmra.mxu3 %vm161_vm3, %v158_v52  ;;  %v352_v51 = vpop.permute.xlu1 %351 }
 0x128   :  { %v181_v59 = vpop.f32.mrf.mxu2  ;;  %v194_v60 = vpop.f32.mrf.mxu3 }
 0x129   :  { %v204_v63 = vmul.f32 %v202_v55, %v181_v59  ;;  %v205_v0 = vmul.f32 %v202_v55, %v194_v60 }
 0x12b   :  { %v212_v5 = vadd.f32 %v210_v3, %v204_v63  ;;  %v213_v6 = vadd.f32 %v210_v3, %v205_v0 }
 0x12d   :  { %v226_v7 = vmul.f32 %v225_v4, %v212_v5  ;;  %v227_v8 = vmul.f32 %v225_v4, %v213_v6 }
 0x12f   :  { %v228_v11 = vadd.f32 %v226_v7, %v223_v9  ;;  %v229_v12 = vadd.f32 %v227_v8, %v224_v10 }
 0x130   :  { %v196_v13 = vpop.f32.mrf.mxu3  ;;  %v183_v14 = vpop.f32.mrf.mxu2 }
 0x131   :  { %v230_v15 = vmax.f32 %v228_v11, 0.0  ;;  %v231_v16 = vmax.f32 %v229_v12, 0.0 }
 0x133   :  { %v234_v17 = vpack.c.bf16 %v230_v15, %v230_v15  ;;  %v235_v18 = vpack.c.bf16 %v231_v16, %v231_v16 }
 0x135   :  { %v240_v19 = vsel %vm165_vm2, %v234_v17, 0  ;;  %v243_v20 = vsel %vm165_vm2, %v235_v18, 0 }
 0x136   :  { %252 = vmatpush.bf16.msrb.mxu2 %v240_v19  ;;  %265 = vmatpush.bf16.msrb.mxu3 %v243_v20 }
 0x139   :  { %388 = vmatmul.msk.bf16.vlgmr.msrb.gmra.mxu2 %vm161_vm3, %v387_v21  ;;  %389 = vmatmul.msk.bf16.vlgmr.msrb.gmra.mxu3 %vm161_vm3, %v387_v21 }
 0x1bc   :  { %v254_v23 = vpop.f32.mrf.mxu2  ;;  %v267_v24 = vpop.f32.mrf.mxu3 }
 0x1bd   :  { %v278_v25 = vmul.f32 %v276_v22, %v254_v23  ;;  %v279_v26 = vmul.f32 %v276_v22, %v267_v24 }
 0x1bf   :  { %v287_v28 = vadd.f32 %v285_v27, %v278_v25  ;;  %v288_v29 = vadd.f32 %v285_v27, %v279_v26 }
 0x1c1   :  { %v408_v30 = vpack.i.bf16 %v288_v29, %v213_v6 }
 0x1c3   :  { %409 = vrot.lane.b32.xlu0 %v408_v30, %s429_s9 }
 0x1c4   :  { %v269_v31 = vpop.f32.mrf.mxu3  ;;  %v256_v32 = vpop.f32.mrf.mxu2 }
 0x1cb   :  { %346 = vperm.xlu0 %405, %v342_v33  }
 0x235   :  { %v410_v34 = vpop.permute.xlu0 %409 }
 0x236   :  { %v412_v35 = vunpack.i.h.bf16 %v410_v34  ;;  %v411_v36 = vunpack.i.l.bf16 %v410_v34 }
 0x238   :  { %v298_v37 = vsel %vm297_vm4, %v212_v5, %v411_v36  ;;  %v299_v38 = vsel %vm297_vm4, %v287_v28, %v412_v35 }
 0x239   :  { %v300_v39 = vmax.f32 %v298_v37, 0.0  ;;  %v301_v40 = vmax.f32 %v299_v38, 0.0 }
 0x23b   :  { %v304_v41 = vpack.c.bf16 %v301_v40, %v300_v39 }
 0x23d   :  { %321 = vmatpush.bf16.msrb.mxu0 %v304_v41  ;;  %v347_v46 = vpop.permute.xlu0 %346 }
 0x240   :  { %396 = vmatmul.msk.bf16.vlgmr.msrb.gmra.mxu0 %vm310_vm5, %v401_v42 }
 0x2bd   :  { %v323_v44 = vpop.f32.mrf.mxu0 }
 0x2be   :  { %v340_v45 = vmul.f32 %v333_v43, %v323_v44 }
 0x2c0   :  { %v354_v47 = vadd.f32 %v347_v46, %v340_v45 }
 0x2c2   :  { %356 = vst [vmem:[%s590_s11] sm:$0xff] %v354_v47 }
 0x2c5   :  { %v325_v49 = vpop.f32.mrf.mxu0 }
 0x2c6   :  { %v341_v50 = vmul.f32 %v338_v48, %v325_v49 }
 0x2c8   :  { %v355_v52 = vadd.f32 %v352_v51, %v341_v50 }
 0x2ca   :  { %357 = vst [vmem:[%s590_s11 + $0x8] sm:$0xff] %v355_v52 }
 0x2cb   :  { %362 = vsyncpa [#allocation3], 1 }

// kernel: _lambda_.4
= control target key start
LH: loop header
LB: loop body
LE: loop exit
PB: predicated region body
PF: predicated region fallthrough
CT: control target
= control target key end

     0   :  { %13 = vsyncpa [#allocation3], 0  ;;  %s382_s30 = smov [#allocation2]   ;;  %s523_s0 = inlined_call_operand.vmem [shape: f32[2,3], index: 0, kind: input, shape index: {}]   ;;  %s524_s1 = inlined_call_operand.vmem [shape: f32[16,128], index: 1, kind: input, shape index: {}]   ;;  %s525_s2 = inlined_call_operand.vmem [shape: bf16[2,16,16], index: 2, kind: input, shape index: {}]   ;;  %s526_s3 = inlined_call_operand.vmem [shape: f32[2,16,1], index: 3, kind: input, shape index: {}]   ;;  %s527_s4 = inlined_call_operand.vmem [shape: f32[2,16,1], index: 4, kind: input, shape index: {}]   ;;  %s528_s5 = inlined_call_operand.vmem [shape: bf16[32,32], index: 5, kind: input, shape index: {}]   ;;  %s529_s6 = inlined_call_operand.vmem [shape: f32[32,1], index: 6, kind: input, shape index: {}]   ;;  %s530_s7 = inlined_call_operand.vmem [shape: f32[32,1], index: 7, kind: input, shape index: {}]   ;;  %s531_s8 = inlined_call_operand.vmem [shape: f32[32,32], index: 8, kind: output, shape index: {}]  }
   0x1   :  { %s19_s29 = sshll.u32 %s523_s0, 4  ;;  %s20_s29 = int_to_ptr.vmem [resolvable:$true] %s19_s29 }
   0x2   :  { %22 = dma.vmem_to_smem %s20_s29, 32, %s382_s30, [#allocation3]  }
   0x3   :  { %380 = dma.done.wait [#allocation3], 32  }
   0x4   :  { %381 = vsyncadd [#allocation3], 4294967264 }
   0x5   :  { %41 = sfence }
   0x6   :  { %v97_v0 = vld [vmem:[%s527_s4] sm:$0xff]  ;;  %s45_s13 = sld [smem:[#allocation2]]  ;;  %v383_v2 = vmov 0   ;;  %v44_v4 = vld [vmem:[%s524_s1 + $0x8] sm:$0xff]  ;;  %v335_v18 = vld [vmem:[%s527_s4 + $0x18] sm:$0xff]  ;;  %vm65_vm0 = vcmask 130048  }
   0x7   :  { %v83_v1 = vld [vmem:[%s526_s3] sm:$0xff]  ;;  %356 = vset.pattern.permute.xlu1 %v383_v2  ;;  %355 = vset.pattern.permute.xlu0 %v383_v2  ;;  %s316_s14 = sld [smem:[#allocation2 + $0x1]]  ;;  %v98_v6 = vld [vmem:[%s527_s4 + $0x8] sm:$0xff]  ;;  %v334_v20 = vld [vmem:[%s527_s4 + $0x10] sm:$0xff]  ;;  %s384_s16 = smov 80   ;;  %vm225_vm1 = vcmask 261120  }
   0x8   :  { %101 = vperm.xlu1 %356, %v97_v0   ;;  %87 = vperm.xlu0 %355, %v83_v1   ;;  %v43_v3 = vld [vmem:[%s524_s1] sm:$0xff]  ;;  %v84_v10 = vld [vmem:[%s526_s3 + $0x8] sm:$0xff]  ;;  %v254_v22 = vld [vmem:[%s529_s6 + $0x18] sm:$0xff]  ;;  %s322_s4 = sld [smem:[#allocation2 + $0x80]] }
   0x9   :  { %357 = vset.pattern.permute.xlu2 %v383_v2  ;;  %v346_v19 = vld [vmem:[%s525_s2] sm:$0xff]  ;;  %v281_v23 = vld [vmem:[%s530_s7 + $0x10] sm:$0xff]  ;;  %s323_s11 = sld [smem:[#allocation2 + $0x81]]  ;;  %v333_v34 = vld [vmem:[%s526_s3 + $0x18] sm:$0xff] }
   0xa   :  { %v251_v21 = vld [vmem:[%s529_s6] sm:$0xff]  ;;  %s324_s12 = sld [smem:[#allocation2 + $0x82]]  ;;  %v332_v25 = vld [vmem:[%s526_s3 + $0x10] sm:$0xff]  ;;  %v347_v54 = vld [vmem:[%s525_s2 + $0x8] sm:$0xff] }
   0xb   :  { %160 = vperm.xlu2 %357, %v332_v25   ;;  %v253_v53 = vld [vmem:[%s529_s6 + $0x10] sm:$0xff]  ;;  %v280_v55 = vld [vmem:[%s530_s7 + $0x8] sm:$0xff] }
   0xc   :  { %v47_v5 = vstv %s45_s13 }
   0xd   :  { %v48_v7 = vmul.f32 %v47_v5, %v43_v3  ;;  %v49_v8 = vmul.f32 %v47_v5, %v44_v4  ;;  %v50_v9 = vstv %s316_s14  ;;  %v282_v5 = vld [vmem:[%s530_s7 + $0x18] sm:$0xff] }
   0xe   :  { %v51_v11 = vmul.f32 %v50_v9, %v43_v3  ;;  %v52_v12 = vmul.f32 %v50_v9, %v44_v4  ;;  %v114_v29 = vstv %s322_s4 }
   0xf   :  { %v117_v30 = vstv %s323_s11  ;;  %v115_v32 = vmul.f32 %v114_v29, %v43_v3  ;;  %v116_v36 = vmul.f32 %v114_v29, %v44_v4 }
  0x10   :  { %106 = vperm.xlu1 %356, %v98_v6   ;;  %v53_v13 = vadd.f32 %v51_v11, %v48_v7  ;;  %v54_v14 = vadd.f32 %v52_v12, %v49_v8  ;;  %92 = vperm.xlu0 %355, %v84_v10   ;;  %v118_v33 = vmul.f32 %v117_v30, %v43_v3  ;;  %v122_v35 = vstv %s324_s12  ;;  %v252_v3 = vld [vmem:[%s529_s6 + $0x8] sm:$0xff] }
  0x11   :  { %v119_v37 = vmul.f32 %v117_v30, %v44_v4  ;;  %v279_v4 = vld [vmem:[%s530_s7] sm:$0xff] }
  0x12   :  { %v55_v15 = vmax.f32 %v53_v13, 0.0  ;;  %v56_v16 = vmax.f32 %v54_v14, 0.0  ;;  %v120_v41 = vadd.f32 %v118_v33, %v115_v32 }
  0x13   :  { %165 = vperm.xlu2 %357, %v333_v34   ;;  %v121_v45 = vadd.f32 %v119_v37, %v116_v36 }
  0x14   :  { %v59_v17 = vpack.c.bf16 %v56_v16, %v55_v15 }
  0x16   :  { %76 = vmatpush.bf16.msra.mxu0 %v59_v17 }
  0x18   :  { %180 = vperm.xlu1 %356, %v335_v18   ;;  %175 = vperm.xlu0 %355, %v334_v20  }
  0x19   :  { %321 = vmatmul.msk.bf16.vlgmr.msra.gmra.mxu0 %vm65_vm0, %v346_v19 }
  0x20   :  { %257 = vperm.xlu1 %356, %v251_v21  }
  0x28   :  { %272 = vperm.xlu1 %356, %v254_v22   ;;  %v348_v22 = vld [vmem:[%s528_s5] sm:$0xff] }
  0x30   :  { %295 = vperm.xlu1 %356, %v281_v23   ;;  %v349_v23 = vld [vmem:[%s528_s5 + $0x8] sm:$0xff] }
  0x65   :  { %v161_v56 = vpop.permute.xlu2 %160 }
  0x6d   :  { %v166_v59 = vpop.permute.xlu2 %165 }
  0x7a   :  { %v88_v24 = vpop.permute.xlu0 %87  ;;  %v102_v26 = vpop.permute.xlu1 %101 }
  0x82   :  { %v93_v38 = vpop.permute.xlu0 %92  ;;  %v107_v43 = vpop.permute.xlu1 %106 }
  0x8a   :  { %v181_v62 = vpop.permute.xlu1 %180  ;;  %v176_v63 = vpop.permute.xlu0 %175 }
  0x96   :  { %v78_v27 = vpop.f32.mrf.mxu0 }
  0x97   :  { %v95_v28 = vmul.f32 %v88_v24, %v78_v27  ;;  %v258_v24 = vpop.permute.xlu1 %257 }
  0x99   :  { %v109_v31 = vadd.f32 %v102_v26, %v95_v28 }
  0x9b   :  { %v123_v42 = vmul.f32 %v122_v35, %v109_v31 }
  0x9d   :  { %v125_v48 = vadd.f32 %v123_v42, %v120_v41 }
  0x9e   :  { %v80_v39 = vpop.f32.mrf.mxu0 }
  0x9f   :  { %v96_v40 = vmul.f32 %v93_v38, %v80_v39  ;;  %v127_v50 = vmax.f32 %v125_v48, 0.0  ;;  %v273_v26 = vpop.permute.xlu1 %272 }
  0xa1   :  { %v110_v44 = vadd.f32 %v107_v43, %v96_v40 }
  0xa3   :  { %v363_v46 = vpack.i.bf16 %v110_v44, %v109_v31  ;;  %v124_v47 = vmul.f32 %v122_v35, %v110_v44 }
  0xa5   :  { %364 = vrot.lane.b32.xlu0 %v363_v46, %s384_s16  ;;  %v126_v49 = vadd.f32 %v124_v47, %v121_v45 }
  0xa7   :  { %v128_v51 = vmax.f32 %v126_v49, 0.0  ;;  %v296_v33 = vpop.permute.xlu1 %295 }
  0xa9   :  { %v132_v52 = vpack.c.bf16 %v128_v51, %v127_v50 }
  0xab   :  { %148 = vmatpush.bf16.msra.mxu1 %v132_v52 }
  0xad   :  { %267 = vperm.xlu0 %355, %v253_v53  }
  0xae   :  { %331 = vmatmul.msk.bf16.vlgmr.msra.gmra.mxu1 %vm65_vm0, %v347_v54 }
  0xb5   :  { %290 = vperm.xlu0 %355, %v280_v55  }
 0x117   :  { %v365_v6 = vpop.permute.xlu0 %364 }
 0x118   :  { %v367_v7 = vunpack.i.h.bf16 %v365_v6  ;;  %v366_v8 = vunpack.i.l.bf16 %v365_v6 }
 0x11a   :  { %v201_v14 = vsel %vm65_vm0, %v109_v31, %v366_v8  ;;  %v202_v15 = vsel %vm65_vm0, %v110_v44, %v367_v7 }
 0x11b   :  { %v205_v19 = vmax.f32 %v201_v14, 0.0  ;;  %v206_v20 = vmax.f32 %v202_v15, 0.0 }
 0x11d   :  { %v213_v21 = vpack.c.bf16 %v206_v20, %v205_v19 }
 0x11f   :  { %v268_v27 = vpop.permute.xlu0 %267 }
 0x127   :  { %v291_v40 = vpop.permute.xlu0 %290 }
 0x12b   :  { %v150_v57 = vpop.f32.mrf.mxu1 }
 0x12c   :  { %v168_v58 = vmul.f32 %v161_v56, %v150_v57 }
 0x12e   :  { %v183_v0 = vadd.f32 %v176_v63, %v168_v58 }
 0x133   :  { %v152_v60 = vpop.f32.mrf.mxu1 }
 0x134   :  { %v169_v61 = vmul.f32 %v166_v59, %v152_v60 }
 0x136   :  { %v184_v1 = vadd.f32 %v181_v62, %v169_v61 }
 0x138   :  { %v358_v2 = vpack.i.bf16 %v184_v1, %v183_v0 }
 0x13a   :  { %359 = vrot.lane.b32.xlu2 %v358_v2, %s384_s16 }
 0x142   :  { %262 = vperm.xlu2 %357, %v252_v3  }
 0x14a   :  { %285 = vperm.xlu2 %357, %v279_v4  }
 0x152   :  { %300 = vperm.xlu2 %357, %v282_v5  }
 0x194   :  { %v360_v9 = vpop.permute.xlu2 %359 }
 0x195   :  { %v362_v10 = vunpack.i.h.bf16 %v360_v9  ;;  %v361_v11 = vunpack.i.l.bf16 %v360_v9 }
 0x197   :  { %v203_v12 = vsel %vm65_vm0, %v183_v0, %v361_v11  ;;  %v204_v13 = vsel %vm65_vm0, %v184_v1, %v362_v10 }
 0x198   :  { %v207_v16 = vmax.f32 %v203_v12, 0.0  ;;  %v208_v17 = vmax.f32 %v204_v13, 0.0 }
 0x19a   :  { %v214_v18 = vpack.c.bf16 %v208_v17, %v207_v16 }
 0x19c   :  { %238 = vmatpush.bf16.msra.mxu2 %v214_v18  ;;  %350 = vmatpush.bf16.msra.mxu3 %v214_v18  ;;  %v263_v25 = vpop.permute.xlu2 %262 }
 0x1a0   :  { %239 = vmatpush.bf16.msra.mxu2 %v213_v21  ;;  %351 = vmatpush.bf16.msra.mxu3 %v213_v21 }
 0x1a3   :  { %344 = vmatmul.msk.bf16.vlgmr.msra.gmra.mxu2 %vm225_vm1, %v348_v22  ;;  %345 = vmatmul.msk.bf16.vlgmr.msra.gmra.mxu3 %vm225_vm1, %v349_v23 }
 0x1a4   :  { %v286_v28 = vpop.permute.xlu2 %285 }
 0x1ac   :  { %v301_v41 = vpop.permute.xlu2 %300 }
 0x226   :  { %v241_v29 = vpop.f32.mrf.mxu2  ;;  %v246_v30 = vpop.f32.mrf.mxu3 }
 0x227   :  { %v275_v31 = vmul.f32 %v258_v24, %v241_v29  ;;  %v277_v32 = vmul.f32 %v268_v27, %v246_v30 }
 0x229   :  { %v303_v34 = vadd.f32 %v286_v28, %v275_v31  ;;  %v305_v35 = vadd.f32 %v296_v33, %v277_v32 }
 0x22b   :  { %307 = vst.msk [vmem:[%s531_s8] sm:$0xff] %vm225_vm1, %v303_v34 }
 0x22c   :  { %309 = vst.msk [vmem:[%s531_s8 + $0x10] sm:$0xff] %vm225_vm1, %v305_v35 }
 0x22e   :  { %v243_v36 = vpop.f32.mrf.mxu2  ;;  %v248_v37 = vpop.f32.mrf.mxu3 }
 0x22f   :  { %v276_v38 = vmul.f32 %v263_v25, %v243_v36  ;;  %v278_v39 = vmul.f32 %v273_v26, %v248_v37 }
 0x231   :  { %v304_v42 = vadd.f32 %v291_v40, %v276_v38  ;;  %v306_v43 = vadd.f32 %v301_v41, %v278_v39 }
 0x233   :  { %308 = vst.msk [vmem:[%s531_s8 + $0x8] sm:$0xff] %vm225_vm1, %v304_v42 }
 0x234   :  { %310 = vst.msk [vmem:[%s531_s8 + $0x18] sm:$0xff] %vm225_vm1, %v306_v43 }
 0x235   :  { %315 = vsyncpa [#allocation3], 1 }

// kernel: _lambda_.5
= control target key start
LH: loop header
LB: loop body
LE: loop exit
PB: predicated region body
PF: predicated region fallthrough
CT: control target
= control target key end

     0   :  { %12 = vsyncpa [#allocation3], 0  ;;  %s568_s27 = smov [#allocation2]   ;;  %s783_s0 = inlined_call_operand.vmem [shape: f32[2,3], index: 0, kind: input, shape index: {}]   ;;  %s784_s1 = inlined_call_operand.vmem [shape: f32[32,32], index: 1, kind: input, shape index: {}]   ;;  %s785_s2 = inlined_call_operand.vmem [shape: bf16[2,32,32], index: 2, kind: input, shape index: {}]   ;;  %s786_s3 = inlined_call_operand.vmem [shape: f32[2,32,1], index: 3, kind: input, shape index: {}]   ;;  %s787_s4 = inlined_call_operand.vmem [shape: f32[2,32,1], index: 4, kind: input, shape index: {}]   ;;  %s788_s5 = inlined_call_operand.vmem [shape: f32[10,64], index: 5, kind: input, shape index: {}]   ;;  %s789_s6 = inlined_call_operand.vmem [shape: f32[10,1], index: 6, kind: input, shape index: {}]   ;;  %s790_s7 = inlined_call_operand.vmem [shape: f32[10,2], index: 7, kind: output, shape index: {}]  }
   0x1   :  { %s18_s26 = sshll.u32 %s783_s0, 4  ;;  %s19_s26 = int_to_ptr.vmem [resolvable:$true] %s18_s26 }
   0x2   :  { %21 = dma.vmem_to_smem %s19_s26, 32, %s568_s27, [#allocation3]  }
   0x3   :  { %566 = dma.done.wait [#allocation3], 32  }
   0x4   :  { %567 = vsyncadd [#allocation3], 4294967264 }
   0x5   :  { %38 = sfence }
   0x6   :  { %v108_v0 = vld [vmem:[%s786_s3 + $0x10] sm:$0xff]  ;;  %s44_s9 = sld [smem:[#allocation2]]  ;;  %v569_v2 = vmov 0   ;;  %v629_v4 = vld [vmem:[%s784_s1 + $0x18] sm:$0xff]  ;;  %v634_v5 = vld [vmem:[%s784_s1] sm:$0xff]  ;;  %vm80_vm0 = vcmask 261120  }
   0x7   :  { %v136_v1 = vld [vmem:[%s787_s4 + $0x10] sm:$0xff]  ;;  %531 = vset.pattern.permute.xlu0 %v569_v2  ;;  %532 = vset.pattern.permute.xlu1 %v569_v2  ;;  %s483_s10 = sld [smem:[#allocation2 + $0x1]]  ;;  %v639_v6 = vld [vmem:[%s784_s1 + $0x8] sm:$0xff]  ;;  %v106_v7 = vld [vmem:[%s786_s3] sm:$0xff]  ;;  %s570_s25 = smov 112   ;;  %vm292_vm1 = vcmask 130048  }
   0x8   :  { %122 = vperm.xlu0 %531, %v108_v0   ;;  %150 = vperm.xlu1 %532, %v136_v1   ;;  %v624_v3 = vld [vmem:[%s784_s1 + $0x10] sm:$0xff]  ;;  %v109_v9 = vld [vmem:[%s786_s3 + $0x18] sm:$0xff]  ;;  %v107_v24 = vld [vmem:[%s786_s3 + $0x8] sm:$0xff]  ;;  %s495_s24 = sld [smem:[#allocation2 + $0x81]]  ;;  %vm421_vm2 = vcmask 7168   ;;  %vm444_vm3 = vcmask 523264  }
   0x9   :  { %533 = vset.pattern.permute.xlu2 %v569_v2  ;;  %v137_v10 = vld [vmem:[%s787_s4 + $0x18] sm:$0xff]  ;;  %v134_v30 = vld [vmem:[%s787_s4] sm:$0xff]  ;;  %v135_v31 = vld [vmem:[%s787_s4 + $0x8] sm:$0xff]  ;;  %s496_s26 = sld [smem:[#allocation2 + $0x82]]  ;;  %vm474_vm4 = vcmask 15360   ;;  %vm476_vm5 = vcmask 9216  }
   0xa   :  { %112 = vperm.xlu2 %533, %v106_v7   ;;  %v521_v33 = vld [vmem:[%s785_s2] sm:$0xff]  ;;  %v522_v34 = vld [vmem:[%s785_s2 + $0x8] sm:$0xff]  ;;  %v514_v35 = vld [vmem:[%s786_s3 + $0x38] sm:$0xff] }
   0xb   :  { %v513_v36 = vld [vmem:[%s786_s3 + $0x30] sm:$0xff]  ;;  %v518_v37 = vld [vmem:[%s787_s4 + $0x38] sm:$0xff]  ;;  %v512_v38 = vld [vmem:[%s786_s3 + $0x28] sm:$0xff] }
   0xc   :  { %v46_v8 = vstv %s44_s9  ;;  %v517_v39 = vld [vmem:[%s787_s4 + $0x30] sm:$0xff]  ;;  %v511_v40 = vld [vmem:[%s786_s3 + $0x20] sm:$0xff]  ;;  %v516_v41 = vld [vmem:[%s787_s4 + $0x28] sm:$0xff]  ;;  %s494_s3 = sld [smem:[#allocation2 + $0x80]] }
   0xd   :  { %v49_v11 = vmul.f32 %v46_v8, %v624_v3  ;;  %v50_v12 = vmul.f32 %v46_v8, %v629_v4  ;;  %v51_v13 = vstv %s483_s10  ;;  %v47_v14 = vmul.f32 %v46_v8, %v634_v5  ;;  %v515_v42 = vld [vmem:[%s787_s4 + $0x20] sm:$0xff] }
   0xe   :  { %v54_v15 = vmul.f32 %v51_v13, %v624_v3  ;;  %v55_v16 = vmul.f32 %v51_v13, %v629_v4  ;;  %v48_v17 = vmul.f32 %v46_v8, %v639_v6  ;;  %v52_v18 = vmul.f32 %v51_v13, %v634_v5 }
   0xf   :  { %v53_v19 = vmul.f32 %v51_v13, %v639_v6  ;;  %v170_v60 = vstv %s495_s24 }
  0x10   :  { %127 = vperm.xlu0 %531, %v109_v9   ;;  %155 = vperm.xlu1 %532, %v137_v10   ;;  %v58_v20 = vadd.f32 %v54_v15, %v49_v11  ;;  %v59_v21 = vadd.f32 %v55_v16, %v50_v12  ;;  %v56_v22 = vadd.f32 %v52_v18, %v47_v14  ;;  %v179_v9 = vstv %s496_s26 }
  0x11   :  { %v57_v23 = vadd.f32 %v53_v19, %v48_v17  ;;  %v173_v63 = vmul.f32 %v170_v60, %v624_v3  ;;  %v174_v1 = vmul.f32 %v170_v60, %v629_v4  ;;  %v172_v7 = vmul.f32 %v170_v60, %v639_v6 }
  0x12   :  { %v62_v25 = vmax.f32 %v58_v20, 0.0  ;;  %v63_v26 = vmax.f32 %v59_v21, 0.0  ;;  %v60_v27 = vmax.f32 %v56_v22, 0.0  ;;  %117 = vperm.xlu2 %533, %v107_v24   ;;  %v165_v59 = vstv %s494_s3 }
  0x13   :  { %v61_v28 = vmax.f32 %v57_v23, 0.0  ;;  %v168_v62 = vmul.f32 %v165_v59, %v624_v3  ;;  %v169_v0 = vmul.f32 %v165_v59, %v629_v4  ;;  %v167_v2 = vmul.f32 %v165_v59, %v639_v6 }
  0x14   :  { %v69_v29 = vpack.c.bf16 %v63_v26, %v62_v25  ;;  %v166_v10 = vmul.f32 %v165_v59, %v634_v5  ;;  %v171_v3 = vmul.f32 %v170_v60, %v634_v5 }
  0x15   :  { %v68_v32 = vpack.c.bf16 %v61_v28, %v60_v27  ;;  %v177_v12 = vadd.f32 %v173_v63, %v168_v62  ;;  %v178_v15 = vadd.f32 %v174_v1, %v169_v0  ;;  %v176_v16 = vadd.f32 %v172_v7, %v167_v2  ;;  %v523_v28 = vld [vmem:[%s785_s2 + $0x10] sm:$0xff] }
  0x16   :  { %93 = vmatpush.bf16.msra.mxu0 %v69_v29  ;;  %525 = vmatpush.bf16.msra.mxu3 %v69_v29  ;;  %v175_v6 = vadd.f32 %v171_v3, %v166_v10  ;;  %v524_v29 = vld [vmem:[%s785_s2 + $0x18] sm:$0xff]  ;;  %s571_s2 = smov 1  }
  0x18   :  { %140 = vperm.xlu0 %531, %v134_v30   ;;  %145 = vperm.xlu1 %532, %v135_v31  }
  0x1a   :  { %94 = vmatpush.bf16.msra.mxu0 %v68_v32  ;;  %526 = vmatpush.bf16.msra.mxu3 %v68_v32 }
  0x1b   :  { %256 = vperm.xlu2 %533, %v514_v35  }
  0x1d   :  { %492 = vmatmul.msk.bf16.vlgmr.msra.gmra.mxu0 %vm80_vm0, %v521_v33  ;;  %493 = vmatmul.msk.bf16.vlgmr.msra.gmra.mxu3 %vm80_vm0, %v522_v34 }
  0x20   :  { %251 = vperm.xlu0 %531, %v513_v36   ;;  %285 = vperm.xlu1 %532, %v518_v37  }
  0x23   :  { %246 = vperm.xlu2 %533, %v512_v38  }
  0x28   :  { %280 = vperm.xlu0 %531, %v517_v39   ;;  %241 = vperm.xlu1 %532, %v511_v40  }
  0x2b   :  { %275 = vperm.xlu2 %533, %v516_v41  }
  0x30   :  { %270 = vperm.xlu0 %531, %v515_v42  }
  0x64   :  { %v113_v46 = vpop.permute.xlu2 %112 }
  0x6c   :  { %v118_v54 = vpop.permute.xlu2 %117 }
  0x75   :  { %v257_v31 = vpop.permute.xlu2 %256 }
  0x7a   :  { %v123_v43 = vpop.permute.xlu0 %122  ;;  %v151_v44 = vpop.permute.xlu1 %150 }
  0x7d   :  { %v247_v32 = vpop.permute.xlu2 %246 }
  0x82   :  { %v128_v45 = vpop.permute.xlu0 %127  ;;  %v156_v47 = vpop.permute.xlu1 %155 }
  0x85   :  { %v276_v33 = vpop.permute.xlu2 %275 }
  0x8a   :  { %v141_v50 = vpop.permute.xlu0 %140  ;;  %v146_v58 = vpop.permute.xlu1 %145 }
  0x92   :  { %v252_v36 = vpop.permute.xlu0 %251  ;;  %v286_v38 = vpop.permute.xlu1 %285 }
  0x9a   :  { %v96_v48 = vpop.f32.mrf.mxu0  ;;  %v281_v37 = vpop.permute.xlu0 %280 }
  0x9b   :  { %v130_v49 = vmul.f32 %v113_v46, %v96_v48  ;;  %v242_v42 = vpop.permute.xlu1 %241 }
  0x9d   :  { %v699_v51 = vadd.f32 %v141_v50, %v130_v49 }
  0x9f   :  { %329 = vrot.lane.b32.xlu2 %v699_v51, %s570_s25  ;;  %v180_v19 = vmul.f32 %v179_v9, %v699_v51 }
  0xa0   :  { %v101_v52 = vpop.f32.mrf.mxu3 }
  0xa1   :  { %v132_v53 = vmul.f32 %v123_v43, %v101_v52  ;;  %v184_v24 = vadd.f32 %v180_v19, %v175_v6 }
  0xa2   :  { %v98_v55 = vpop.f32.mrf.mxu0  ;;  %v271_v41 = vpop.permute.xlu0 %270 }
  0xa3   :  { %v703_v56 = vadd.f32 %v151_v44, %v132_v53  ;;  %v131_v57 = vmul.f32 %v118_v54, %v98_v55  ;;  %v188_v5 = vmax.f32 %v184_v24, 0.0  ;;  %v293_v24 = vsel %vm292_vm1, %v699_v51, 0.0  ;;  %v432_v51 = vld [vmem:[%s789_s6] sm:$0xff] }
  0xa5   :  { %v705_v61 = vadd.f32 %v146_v58, %v131_v57  ;;  %333 = vrot.lane.b32.xlu0 %v703_v56, %s570_s25  ;;  %v182_v13 = vmul.f32 %v179_v9, %v703_v56 }
  0xa7   :  { %331 = vrot.lane.b32.xlu1 %v705_v61, %s570_s25  ;;  %v181_v17 = vmul.f32 %v179_v9, %v705_v61  ;;  %v186_v18 = vadd.f32 %v182_v13, %v177_v12 }
  0xa8   :  { %v103_v8 = vpop.f32.mrf.mxu3 }
  0xa9   :  { %v133_v11 = vmul.f32 %v128_v45, %v103_v8  ;;  %v185_v21 = vadd.f32 %v181_v17, %v176_v16  ;;  %v190_v22 = vmax.f32 %v186_v18, 0.0 }
  0xab   :  { %v161_v14 = vadd.f32 %v156_v47, %v133_v11  ;;  %v189_v26 = vmax.f32 %v185_v21, 0.0 }
  0xad   :  { %335 = vrot.lane.b32.xlu2 %v161_v14, %s570_s25  ;;  %v183_v4 = vmul.f32 %v179_v9, %v161_v14  ;;  %v197_v27 = vpack.c.bf16 %v189_v26, %v188_v5  ;;  %v302_v30 = vsel %vm292_vm1, %v161_v14, 0.0 }
  0xaf   :  { %v187_v20 = vadd.f32 %v183_v4, %v178_v15 }
  0xb1   :  { %v191_v23 = vmax.f32 %v187_v20, 0.0 }
  0xb3   :  { %v198_v25 = vpack.c.bf16 %v191_v23, %v190_v22 }
  0xb5   :  { %221 = vmatpush.bf16.msra.mxu1 %v198_v25 }
  0xb9   :  { %222 = vmatpush.bf16.msra.mxu1 %v197_v27 }
  0xbc   :  { %509 = vmatmul.msk.bf16.vlgmr.msra.gmra.mxu1 %vm80_vm0, %v523_v28 }
  0xcc   :  { %510 = vmatmul.msk.bf16.gmra.mxu1 %vm80_vm0, %v524_v29 }
  0xd6   :  { %303 = vadd.xlane.f32.xlu2 %v302_v30  ;;  %v296_v30 = vsel %vm292_vm1, %v705_v61, 0.0  ;;  %v433_v61 = vld [vmem:[%s789_s6 + $0x8] sm:$0x3] }
  0xf9   :  { %v330_v34 = vpop.permute.xlu2 %329 }
  0xfa   :  { %v341_v35 = vsel %vm292_vm1, %v330_v34, 0.0 }
  0xfb   :  { %342 = vadd.xlane.f32.xlu0 %v341_v35 }
 0x107   :  { %v336_v39 = vpop.permute.xlu2 %335 }
 0x108   :  { %v350_v40 = vsel %vm292_vm1, %v336_v39, 0.0 }
 0x109   :  { %351 = vadd.xlane.f32.xlu0 %v350_v40 }
 0x117   :  { %v334_v43 = vpop.permute.xlu0 %333 }
 0x118   :  { %v347_v44 = vsel %vm292_vm1, %v334_v43, 0.0 }
 0x119   :  { %348 = vadd.xlane.f32.xlu1 %v347_v44  ;;  %v332_v45 = vpop.permute.xlu1 %331 }
 0x11a   :  { %v344_v46 = vsel %vm292_vm1, %v332_v45, 0.0 }
 0x11b   :  { %345 = vadd.xlane.f32.xlu2 %v344_v46 }
 0x139   :  { %v224_v47 = vpop.f32.mrf.mxu1 }
 0x13a   :  { %v259_v48 = vmul.f32 %v242_v42, %v224_v47 }
 0x13c   :  { %v288_v49 = vadd.f32 %v271_v41, %v259_v48 }
 0x13e   :  { %361 = vrot.lane.b32.xlu1 %v288_v49, %s570_s25  ;;  %v309_v50 = vsel %vm292_vm1, %v288_v49, 0.0 }
 0x13f   :  { %310 = vadd.xlane.f32.xlu2 %v309_v50 }
 0x141   :  { %v226_v52 = vpop.f32.mrf.mxu1 }
 0x142   :  { %v260_v53 = vmul.f32 %v247_v32, %v226_v52 }
 0x144   :  { %v289_v54 = vadd.f32 %v276_v33, %v260_v53 }
 0x146   :  { %363 = vrot.lane.b32.xlu0 %v289_v54, %s570_s25  ;;  %v312_v59 = vsel %vm292_vm1, %v289_v54, 0.0 }
 0x149   :  { %v229_v55 = vpop.f32.mrf.mxu1  ;;  %v743_v1 = vpop.xlane.xlu2 %303 }
 0x14a   :  { %v261_v57 = vmul.f32 %v252_v36, %v229_v55  ;;  %v308_v53 = vmul.f32 0.0625, %v743_v1 }
 0x14c   :  { %v290_v58 = vadd.f32 %v281_v37, %v261_v57  ;;  %v299_v37 = vsel %vm292_vm1, %v703_v56, 0.0 }
 0x14e   :  { %v315_v0 = vsel %vm292_vm1, %v290_v58, 0.0 }
 0x151   :  { %v231_v60 = vpop.f32.mrf.mxu1 }
 0x152   :  { %v262_v62 = vmul.f32 %v257_v31, %v231_v60 }
 0x154   :  { %v291_v63 = vadd.f32 %v286_v38, %v262_v62 }
 0x156   :  { %v318_v12 = vsel %vm292_vm1, %v291_v63, 0.0 }
 0x157   :  { %365 = vrot.lane.b32.xlu2 %v290_v58, %s570_s25 }
 0x168   :  { %313 = vadd.xlane.f32.xlu1 %v312_v59 }
 0x16e   :  { %v343_v2 = vpop.xlane.xlu0 %342 }
 0x16f   :  { %v353_v8 = vmul.f32 0.0625, %v343_v2 }
 0x17c   :  { %v352_v13 = vpop.xlane.xlu0 %351 }
 0x17d   :  { %v356_v19 = vmul.f32 0.0625, %v352_v13 }
 0x180   :  { %316 = vadd.xlane.f32.xlu2 %v315_v0 }
 0x181   :  { %367 = vrot.lane.b32.xlu1 %v291_v63, %s570_s25 }
 0x18c   :  { %v349_v11 = vpop.xlane.xlu1 %348 }
 0x18d   :  { %v355_v6 = vmul.f32 0.0625, %v349_v11 }
 0x18e   :  { %v346_v7 = vpop.xlane.xlu2 %345 }
 0x18f   :  { %v354_v9 = vmul.f32 0.0625, %v346_v7  ;;  %v544_v20 = vpack.i.bf16 %v355_v6, %v356_v19 }
 0x191   :  { %v549_v10 = vpack.i.bf16 %v353_v8, %v354_v9 }
 0x1ab   :  { %319 = vadd.xlane.f32.xlu1 %v318_v12  ;;  %v431_v12 = vld [vmem:[%s788_s5 + $0x8] sm:$0x3] }
 0x1b0   :  { %v362_v3 = vpop.permute.xlu1 %361 }
 0x1b1   :  { %v373_v14 = vsel %vm292_vm1, %v362_v3, 0.0 }
 0x1b2   :  { %v311_v15 = vpop.xlane.xlu2 %310  ;;  %374 = vadd.xlane.f32.xlu2 %v373_v14 }
 0x1b3   :  { %v321_v49 = vmul.f32 0.0625, %v311_v15 }
 0x1b8   :  { %v364_v16 = vpop.permute.xlu0 %363 }
 0x1b9   :  { %v376_v17 = vsel %vm292_vm1, %v364_v16, 0.0 }
 0x1ba   :  { %v366_v4 = vpop.permute.xlu2 %365  ;;  %377 = vadd.xlane.f32.xlu2 %v376_v17 }
 0x1bb   :  { %v379_v18 = vsel %vm292_vm1, %v366_v4, 0.0 }
 0x1bc   :  { %380 = vadd.xlane.f32.xlu1 %v379_v18 }
 0x1d2   :  { %545 = vrot.lane.b32.xlu2 %v544_v20, %s571_s2 }
 0x1db   :  { %v314_v21 = vpop.xlane.xlu1 %313 }
 0x1dc   :  { %v322_v56 = vmul.f32 0.0625, %v314_v21 }
 0x1f3   :  { %v368_v22 = vpop.permute.xlu1 %367  ;;  %v317_v25 = vpop.xlane.xlu2 %316 }
 0x1f4   :  { %v382_v23 = vsel %vm292_vm1, %v368_v22, 0.0  ;;  %v323_v43 = vmul.f32 0.0625, %v317_v25 }
 0x1f5   :  { %383 = vadd.xlane.f32.xlu0 %v382_v23 }
 0x1fb   :  { %294 = vadd.xlane.f32.xlu2 %v293_v24 }
 0x21e   :  { %v320_v31 = vpop.xlane.xlu1 %319 }
 0x21f   :  { %v324_v40 = vmul.f32 0.0625, %v320_v31 }
 0x225   :  { %v375_v26 = vpop.xlane.xlu2 %374 }
 0x226   :  { %v385_v27 = vmul.f32 0.0625, %v375_v26 }
 0x22d   :  { %v378_v5 = vpop.xlane.xlu2 %377 }
 0x22e   :  { %v386_v28 = vmul.f32 0.0625, %v378_v5 }
 0x22f   :  { %v381_v32 = vpop.xlane.xlu1 %380 }
 0x230   :  { %v534_v29 = vpack.i.bf16 %v385_v27, %v386_v28  ;;  %v387_v34 = vmul.f32 0.0625, %v381_v32 }
 0x232   :  { %535 = vrot.lane.b32.xlu1 %v534_v29, %s571_s2 }
 0x235   :  { %v546_v46 = vpop.permute.xlu2 %545 }
 0x236   :  { %v547_v50 = vunpack.i.l.bf16 %v546_v46  ;;  %v548_v58 = vunpack.i.h.bf16 %v546_v46 }
 0x238   :  { %v425_v55 = vsel %vm421_vm2, %v308_v53, %v547_v50 }
 0x25c   :  { %297 = vadd.xlane.f32.xlu1 %v296_v30 }
 0x268   :  { %v384_v33 = vpop.xlane.xlu0 %383 }
 0x269   :  { %v388_v35 = vmul.f32 0.0625, %v384_v33 }
 0x26b   :  { %v539_v36 = vpack.i.bf16 %v387_v34, %v388_v35 }
 0x26d   :  { %540 = vrot.lane.b32.xlu0 %v539_v36, %s571_s2 }
 0x26e   :  { %v295_v63 = vpop.xlane.xlu2 %294 }
 0x26f   :  { %v305_v9 = vmul.f32 0.0625, %v295_v63 }
 0x275   :  { %436 = vperm.xlu1 %532, %v432_v51  }
 0x297   :  { %300 = vadd.xlane.f32.xlu0 %v299_v37 }
 0x2a4   :  { %v536_v38 = vpop.permute.xlu1 %535 }
 0x2a5   :  { %v537_v44 = vunpack.i.l.bf16 %v536_v38  ;;  %v538_v47 = vunpack.i.h.bf16 %v536_v38 }
 0x2a7   :  { %v427_v52 = vsel %vm421_vm2, %v322_v56, %v537_v44  ;;  %v426_v54 = vsel %vm421_vm2, %v321_v49, %v538_v47 }
 0x2ab   :  { %550 = vrot.lane.b32.xlu0 %v549_v10, %s571_s2  ;;  %v430_v10 = vld [vmem:[%s788_s5] sm:$0xff] }
 0x2b3   :  { %441 = vperm.xlu0 %531, %v433_v61  }
 0x2cf   :  { %v298_v62 = vpop.xlane.xlu1 %297 }
 0x2d0   :  { %v306_v2 = vmul.f32 0.0625, %v298_v62 }
 0x2df   :  { %v541_v39 = vpop.permute.xlu0 %540 }
 0x2e0   :  { %v543_v41 = vunpack.i.h.bf16 %v541_v39  ;;  %v542_v42 = vunpack.i.l.bf16 %v541_v39 }
 0x2e2   :  { %v429_v45 = vsel %vm421_vm2, %v324_v40, %v542_v42  ;;  %v428_v48 = vsel %vm421_vm2, %v323_v43, %v543_v41 }
 0x2e3   :  { %459 = vmatpush.msra.mxu2 %v429_v45 }
 0x2e5   :  { %460 = vmatpush.msra.mxu2 %v428_v48 }
 0x2e7   :  { %461 = vmatpush.msra.mxu2 %v427_v52  ;;  %v437_v13 = vpop.permute.xlu1 %436 }
 0x2e9   :  { %462 = vmatpush.msra.mxu2 %v426_v54 }
 0x2eb   :  { %463 = vmatpush.msra.mxu2 %v425_v55 }
 0x30a   :  { %v301_v57 = vpop.xlane.xlu0 %300 }
 0x30b   :  { %v307_v59 = vmul.f32 0.0625, %v301_v57 }
 0x30d   :  { %v424_v60 = vsel %vm421_vm2, %v307_v59, %v548_v58 }
 0x30e   :  { %464 = vmatpush.msra.mxu2 %v424_v60 }
 0x31d   :  { %v551_v0 = vpop.permute.xlu0 %550 }
 0x31e   :  { %v553_v7 = vunpack.i.h.bf16 %v551_v0  ;;  %v552_v8 = vunpack.i.l.bf16 %v551_v0 }
 0x320   :  { %v423_v1 = vsel %vm421_vm2, %v306_v2, %v552_v8  ;;  %v422_v11 = vsel %vm421_vm2, %v305_v9, %v553_v7 }
 0x321   :  { %465 = vmatpush.msra.mxu2 %v423_v1 }
 0x323   :  { %466 = vmatpush.msra.mxu2 %v422_v11 }
 0x324   :  { %519 = vmatmul.msk.f32.vlgmr.msra.gmra.mxu2 %vm444_vm3, %v430_v10 }
 0x325   :  { %v442_v15 = vpop.permute.xlu0 %441 }
 0x32c   :  { %520 = vmatmul.msk.f32.gmra.mxu2 %vm444_vm3, %v431_v12 }
 0x3a7   :  { %v468_v3 = vpop.f32.mrf.mxu2 }
 0x3a8   :  { %v469_v14 = vadd.f32 %v468_v3, %v437_v13 }
 0x3aa   :  { %475 = vst.msk [vmem:[%s790_s7] sm:$0xff] %vm474_vm4, %v469_v14 }
 0x3af   :  { %v471_v16 = vpop.f32.mrf.mxu2 }
 0x3b0   :  { %v472_v17 = vadd.f32 %v471_v16, %v442_v15 }
 0x3b2   :  { %477 = vst.msk [vmem:[%s790_s7 + $0x8] sm:$0x3] %vm476_vm5, %v472_v17 }
 0x3b3   :  { %482 = vsyncpa [#allocation3], 1 }

</bundles_post_ra>
